<compile_context>
chip_gen: v6e
topology: v6e:2x2x1
jax: 0.10.0
libtpu: 0.0.40
codegen_flags: <defaults>
</compile_context>

<pallas_src>
import functools

import jax
import jax.numpy as jnp
from jax import lax
from jax.experimental import pallas as pl
from jax.experimental.pallas import tpu as pltpu

NEG_SLOPE = 0.01   # nn.LeakyReLU default
BN_EPS = 1e-5      # nn.BatchNorm2d default

# conv configs of the UpBlock chain: (kh, kw, dilation, padding)
_CONV1 = (3, 3, 1, 1)
_CONV2 = (3, 3, 2, 2)
_CONV3 = (2, 2, 2, 1)
_RING = 2            # canvas zero-ring width = max padding over the chain
_CHUNK_CAP = 512     # lane-dim chunk size (bounds in-kernel im2col temporaries)
_CH_ALIGN = 16       # pad channel counts to this (bf16 sublane tile)
_STATIC_UNROLL = 4   # static Python unroll up to this many chunks, else fori_loop


def _round_up(v, m):
    return ((v + m - 1) // m) * m


def _tap_offsets(kh, kw, dil, pad, wc):
    """Flat-canvas offsets of the conv taps relative to the output position."""
    return tuple((dy * dil - pad) * wc + (dx * dil - pad)
                 for dy in range(kh) for dx in range(kw))


def _im2col_weight(w_oihw, cin_pad, cout_pad):
    """(Cout,Cin,kh,kw) -> (cout_pad, kh*kw*cin_pad); rows match tap-major patches."""
    cout, cin, kh, kw = w_oihw.shape
    w = jnp.pad(w_oihw, ((0, cout_pad - cout), (0, cin_pad - cin), (0, 0), (0, 0)))
    return jnp.transpose(w, (0, 2, 3, 1)).reshape(cout_pad, kh * kw * cin_pad)


def _fold_epilogue(bias, bn, rows):
    """Pack conv-bias + LeakyReLU + eval-BN into (rows, 4) = [b, s, neg*s, t]."""
    gamma, beta, rmean, rvar = bn
    scale = gamma * jax.lax.rsqrt(rvar + BN_EPS)
    shift = beta - rmean * scale
    packed = jnp.stack([bias, scale, NEG_SLOPE * scale, shift], axis=-1)
    return jnp.pad(packed, ((0, rows - packed.shape[0]), (0, 0)))


def _run_chunks(n_chunks, body):
    """Static unroll for small chunk counts, lax.fori_loop otherwise."""
    if n_chunks <= _STATIC_UNROLL:
        for c in range(n_chunks):
            body(c)
    else:
        def step(c, carry):
            body(c)
            return carry
        lax.fori_loop(0, n_chunks, step, 0)


def _aligned(v, mult=128):
    """Alignment hint for traced chunk offsets (no-op for Python ints)."""
    return v if isinstance(v, int) else pl.multiple_of(v, mult)


# ----------------------------------------------------------------------------
# Fused whole-chain kernel
# ----------------------------------------------------------------------------
def _upblock_kernel(x_ref, w1_ref, w2_ref, w3_ref, w4_ref, par_ref, mask_ref,
                    o_ref, act_a, act_b,
                    *, cout, cp, m_off, lc_pad, tc, n_chunks,
                    offs1, offs2, offs3):
    f32 = jnp.float32
    bf16 = jnp.bfloat16

    # Canvas margins ([0, m_off) and [m_off+lc_pad, lbuf)) are only ever READ
    # (they supply the convs' zero padding); the interior is fully rewritten
    # every grid step.  Re-zero just the margins each step (a few KB, and safe
    # when the batch axis is split across TensorCores) instead of the whole
    # canvas.
    zmargin = jnp.zeros((cp, m_off), bf16)
    act_a[:, 0:m_off] = zmargin
    act_a[:, m_off + lc_pad:m_off + lc_pad + m_off] = zmargin
    act_b[:, 0:m_off] = zmargin
    act_b[:, m_off + lc_pad:m_off + lc_pad + m_off] = zmargin

    # Hoisted per-conv epilogue params, broadcast once to (rows, tc):
    # [bias, scale, NEG_SLOPE*scale, shift].
    def load_params(idx, rows):
        p = par_ref[idx]                       # (cp, 4) f32
        return tuple(jnp.broadcast_to(p[0:rows, k:k + 1], (rows, tc))
                     for k in range(4))

    prm1 = load_params(0, cp)
    prm2 = load_params(1, cp)
    prm3 = load_params(2, cp)
    prm4 = load_params(3, cout)

    def epilogue(acc, prm):
        b, s, ns, t = prm
        a = acc + b
        return jnp.where(a >= 0.0, s, ns) * a + t

    def conv_chunk(src_ref, w_ref, offs, base):
        # im2col: taps x channels folded into a single MXU contraction dim.
        patch = jnp.concatenate(
            [src_ref[:, pl.ds(base + off, tc)] for off in offs], axis=0)
        return jnp.dot(w_ref[...], patch, preferred_element_type=f32)

    # conv1 (3x3, pad 1) -> upE1 canvas (full cp-row tile stores; padded rows
    # are exact zeros because weights/bias/scale/shift rows cout:cp are zero).
    def conv1_body(c):
        c0 = _aligned(c * tc)
        base = _aligned(m_off + c0)
        msk = mask_ref[:, pl.ds(c0, tc)]
        e1 = epilogue(conv_chunk(x_ref, w1_ref, offs1, base), prm1) * msk
        act_a[:, pl.ds(base, tc)] = e1.astype(bf16)

    # conv2 (3x3, dilation 2, pad 2) -> upE2 canvas.
    def conv2_body(c):
        c0 = _aligned(c * tc)
        base = _aligned(m_off + c0)
        msk = mask_ref[:, pl.ds(c0, tc)]
        e2 = epilogue(conv_chunk(act_a, w2_ref, offs2, base), prm2) * msk
        act_b[:, pl.ds(base, tc)] = e2.astype(bf16)

    # conv3 (2x2, dilation 2, pad 1) + fused channel-concat + 1x1 conv4 + store.
    # conv3's output is NOT masked: conv4 is 1x1, so ring/tail values only land
    # on output positions that the wrapper crops away.
    def conv3_body(c):
        c0 = _aligned(c * tc)
        base = _aligned(m_off + c0)
        e3 = epilogue(conv_chunk(act_b, w3_ref, offs3, base), prm3)
        cat = jnp.concatenate(
            [act_a[:, pl.ds(base, tc)],
             act_b[:, pl.ds(base, tc)],
             e3.astype(bf16)], axis=0)                       # (3*cp, tc)
        a4 = jnp.dot(w4_ref[...], cat, preferred_element_type=f32)
        o_ref[:, pl.ds(c0, tc)] = epilogue(a4, prm4)

    _run_chunks(n_chunks, conv1_body)
    _run_chunks(n_chunks, conv2_body)
    _run_chunks(n_chunks, conv3_body)


# ----------------------------------------------------------------------------
# Wrapper: canvas construction, weight packing, pallas_call, interior crop
# ----------------------------------------------------------------------------
def upblock_conv_chain(upB_nchw, params):
    (w1, b1, bn1) = params["c1"]
    (w2, b2, bn2) = params["c2"]
    (w3, b3, bn3) = params["c3"]
    (w4, b4, bn4) = params["c4"]

    n, c1_in, h2, w2d = upB_nchw.shape
    cout = w1.shape[0]
    assert w1.shape[1] == c1_in and w4.shape[1] == 3 * cout

    ring = _RING
    hc, wc = h2 + 2 * ring, w2d + 2 * ring
    lc = hc * wc

    offs1 = _tap_offsets(*_CONV1, wc)
    offs2 = _tap_offsets(*_CONV2, wc)
    offs3 = _tap_offsets(*_CONV3, wc)
    max_off = max(abs(o) for o in offs1 + offs2 + offs3)
    m_off = _round_up(max_off, 128)          # lane-aligned canvas margin
    assert m_off >= max_off

    # Lane-aligned chunking: tc and lc_pad are always multiples of 128 so every
    # chunk slice / store in the kernel is lane-dense.
    if lc <= _CHUNK_CAP:
        tc = _round_up(lc, 128)
        lc_pad = tc
    else:
        tc = _CHUNK_CAP
        lc_pad = _round_up(lc, tc)
    n_chunks = lc_pad // tc
    lbuf = m_off + lc_pad + m_off

    c1p = _round_up(c1_in, _CH_ALIGN)        # padded Cin for conv1
    cp = _round_up(cout, _CH_ALIGN)          # padded channels for conv2/3/4

    # Zero-ringed, zero-margined flattened canvas input.  Cast to bf16 FIRST so
    # the subsequent pads move half the bytes.
    xb = upB_nchw.astype(jnp.bfloat16)
    xcan = jnp.pad(xb, ((0, 0), (0, c1p - c1_in), (ring, ring), (ring, ring)))
    xf = jnp.pad(xcan.reshape(n, c1p, lc),
                 ((0, 0), (0, 0), (m_off, m_off + lc_pad - lc)))

    # Interior mask over the flattened canvas (re-zeroes the ring/tail after
    # conv1 and conv2 so the canvases keep providing zero padding).
    mask = jnp.zeros((hc, wc), jnp.float32).at[ring:ring + h2, ring:ring + w2d].set(1.0)
    mask = jnp.pad(mask.reshape(1, lc), ((0, 0), (0, lc_pad - lc)))

    # im2col weights, zero-padded on both Cin (tile-aligned patches) and Cout
    # (full-sublane-tile canvas stores).
    w1r = _im2col_weight(w1, c1p, cp).astype(jnp.bfloat16)
    w2r = _im2col_weight(w2, cp, cp).astype(jnp.bfloat16)
    w3r = _im2col_weight(w3, cp, cp).astype(jnp.bfloat16)
    # 1x1 conv4 over concat([upE1, upE2, upE3]); columns padded per cp-row group.
    w4r = jnp.pad(w4.reshape(cout, 3, cout),
                  ((0, 0), (0, 0), (0, cp - cout))).reshape(cout, 3 * cp)
    w4r = w4r.astype(jnp.bfloat16)

    par = jnp.stack([_fold_epilogue(b1, bn1, cp), _fold_epilogue(b2, bn2, cp),
                     _fold_epilogue(b3, bn3, cp), _fold_epilogue(b4, bn4, cp)],
                    axis=0)                                   # (4, cp, 4)

    kernel = functools.partial(
        _upblock_kernel, cout=cout, cp=cp, m_off=m_off, lc_pad=lc_pad, tc=tc,
        n_chunks=n_chunks, offs1=offs1, offs2=offs2, offs3=offs3)

    # Resident-VMEM estimate: double-buffered I/O blocks + weights + scratch.
    weight_bytes = 2 * (w1r.size + w2r.size + w3r.size + w4r.size)
    est = (2 * c1p * lbuf * 2 + 2 * weight_bytes + 2 * par.size * 4
           + 2 * lc_pad * 4 + 2 * cout * lc_pad * 4 + 2 * cp * lbuf * 2)
    vmem_limit = int(min(max(est * 1.25 + (4 << 20), 32 << 20), 100 << 20))

    out_flat = pl.pallas_call(
        kernel,
        out_shape=jax.ShapeDtypeStruct((n, cout, lc_pad), jnp.float32),
        grid=(n,),
        in_specs=[
            pl.BlockSpec((None, c1p, lbuf), lambda b: (b, 0, 0)),
            pl.BlockSpec(w1r.shape, lambda b: (0, 0)),
            pl.BlockSpec(w2r.shape, lambda b: (0, 0)),
            pl.BlockSpec(w3r.shape, lambda b: (0, 0)),
            pl.BlockSpec(w4r.shape, lambda b: (0, 0)),
            pl.BlockSpec(par.shape, lambda b: (0, 0, 0)),
            pl.BlockSpec((1, lc_pad), lambda b: (0, 0)),
        ],
        out_specs=pl.BlockSpec((None, cout, lc_pad), lambda b: (b, 0, 0)),
        scratch_shapes=[
            pltpu.VMEM((cp, lbuf), jnp.bfloat16),   # upE1 canvas
            pltpu.VMEM((cp, lbuf), jnp.bfloat16),   # upE2 canvas
        ],
        compiler_params=pltpu.CompilerParams(
            dimension_semantics=("parallel",),
            vmem_limit_bytes=vmem_limit),
    )(xf, w1r, w2r, w3r, w4r, par, mask)

    # Crop the canvas back to the (N, Cout, 2H, 2W) interior (NCHW out).
    out = out_flat[:, :, :lc].reshape(n, cout, hc, wc)
    return out[:, :, ring:ring + h2, ring:ring + w2d]


# ----------------------------------------------------------------------------
# Glue (pure data movement) in plain JAX
# ----------------------------------------------------------------------------
def pixel_shuffle2(x_nchw):
    """nn.PixelShuffle(2): (N, 4C, H, W) -> (N, C, 2H, 2W)."""
    n, c, h, w = x_nchw.shape
    cps = c // 4
    x = x_nchw.reshape(n, cps, 2, 2, h, w)
    x = jnp.transpose(x, (0, 1, 4, 2, 5, 3))
    return x.reshape(n, cps, 2 * h, 2 * w)


@jax.jit
def _upblock_forward(params, x_nchw, skip_nchw):
    upA = pixel_shuffle2(x_nchw)
    # dropout1 / dropout2 / dropout3: identity at inference
    upB = jnp.concatenate([upA, skip_nchw], axis=1)
    return upblock_conv_chain(upB, params)


# ----------------------------------------------------------------------------
# Pure-JAX reference (same bf16 quantization points) for tolerance testing
# ----------------------------------------------------------------------------
def _ref_conv_bn_act(h, wbbn, dil, pad):
    w, b, bn = wbbn
    y = lax.conv_general_dilated(
        h.astype(jnp.bfloat16), w.astype(jnp.bfloat16),
        window_strides=(1, 1), padding=((pad, pad), (pad, pad)),
        rhs_dilation=(dil, dil),
        dimension_numbers=("NCHW", "OIHW", "NCHW"),
        preferred_element_type=jnp.float32)
    y = y + b[None, :, None, None]
    y = jnp.where(y >= 0, y, NEG_SLOPE * y)
    gamma, beta, rmean, rvar = bn
    scale = gamma * jax.lax.rsqrt(rvar + BN_EPS)
    shift = beta - rmean * scale
    return y * scale[None, :, None, None] + shift[None, :, None, None]


@jax.jit
def _ref_forward(params, x, skip):
    upA = pixel_shuffle2(x)
    upB = jnp.concatenate([upA, skip], axis=1)
    e1 = _ref_conv_bn_act(upB, params["c1"], 1, 1)
    e2 = _ref_conv_bn_act(e1, params["c2"], 2, 2)
    e3 = _ref_conv_bn_act(e2, params["c3"], 2, 1)
    cat = jnp.concatenate([e1, e2, e3], axis=1)
    return _ref_conv_bn_act(cat, params["c4"], 1, 0)


# ----------------------------------------------------------------------------
# UpBlock module (deterministic synthetic parameters)
# ----------------------------------------------------------------------------
class UpBlockPallas:
    def __init__(self, in_filters, out_filters, skip_filters, dropout_rate,
                 drop_out=True, key=jax.random.PRNGKey(42)):
        del dropout_rate, drop_out  # dropout = identity at inference
        self.in_filters = in_filters
        self.out_filters = out_filters
        c1_in = in_filters // 4 + skip_filters

        ks = jax.random.split(key, 8)

        def conv_w(k, cout, cin, kh, kw):
            fan_in = cin * kh * kw
            return jax.random.normal(k, (cout, cin, kh, kw), jnp.float32) / jnp.sqrt(fan_in)

        def conv_b(k, cout):
            return 0.01 * jax.random.normal(k, (cout,), jnp.float32)

        def bn_params(c, i):
            idx = jnp.arange(c, dtype=jnp.float32)
            gamma = 1.0 + 0.01 * (idx + i)
            beta = 0.01 * (idx - i)
            rmean = 0.005 * idx
            rvar = 1.0 + 0.02 * idx
            return (gamma, beta, rmean, rvar)

        self.p = {
            "c1": (conv_w(ks[0], out_filters, c1_in, 3, 3),
                   conv_b(ks[1], out_filters), bn_params(out_filters, 1)),
            "c2": (conv_w(ks[2], out_filters, out_filters, 3, 3),
                   conv_b(ks[3], out_filters), bn_params(out_filters, 2)),
            "c3": (conv_w(ks[4], out_filters, out_filters, 2, 2),
                   conv_b(ks[5], out_filters), bn_params(out_filters, 3)),
            "c4": (conv_w(ks[6], out_filters, out_filters * 3, 1, 1),
                   conv_b(ks[7], out_filters), bn_params(out_filters, 4)),
        }

    def __call__(self, x_nchw, skip_nchw):
        return _upblock_forward(self.p, x_nchw, skip_nchw)


if __name__ == "__main__":
    key = jax.random.PRNGKey(0)

    # (N, in_filters, out_filters, skip_filters, H, W)
    # config 0: single-chunk static-unrolled path; config 1: lax.fori_loop path.
    configs = [
        (2, 16, 8, 8, 8, 8),
        (1, 16, 8, 8, 24, 24),
    ]

    for cfg_i, (N, in_f, out_f, skip_f, H, W) in enumerate(configs):
        kx, kskip, kp = jax.random.split(jax.random.fold_in(key, cfg_i), 3)
        x = jax.random.normal(kx, (N, in_f, H, W), jnp.float32)
        skip = jax.random.normal(kskip, (N, skip_f, 2 * H, 2 * W), jnp.float32)

        block = UpBlockPallas(in_f, out_f, skip_f,
                              dropout_rate=0.2, drop_out=True, key=kp)
        out = jax.block_until_ready(block(x, skip))

        assert out.shape == (N, out_f, 2 * H, 2 * W), out.shape
        assert out.dtype == jnp.float32
        assert bool(jnp.all(jnp.isfinite(out)))

        ref = jax.block_until_ready(_ref_forward(block.p, x, skip))
        assert bool(jnp.allclose(out, ref, rtol=2e-2, atol=2e-2)), (
            float(jnp.max(jnp.abs(out - ref))))

    print("KERNEL_OK")
</pallas_src>

<mosaic_0001>
module attributes {stable_mosaic.version = 11 : i64} {
  func.func @_upblock_kernel(%arg0: i32, %arg1: memref<1x16x768xbf16, #tpu.memory_space<vmem>>, %arg2: memref<16x144xbf16, #tpu.memory_space<vmem>>, %arg3: memref<16x144xbf16, #tpu.memory_space<vmem>>, %arg4: memref<16x64xbf16, #tpu.memory_space<vmem>>, %arg5: memref<8x48xbf16, #tpu.memory_space<vmem>>, %arg6: memref<4x16x4xf32, #tpu.memory_space<vmem>>, %arg7: memref<1x512xf32, #tpu.memory_space<vmem>>, %arg8: memref<1x8x512xf32, #tpu.memory_space<vmem>>, %arg9: memref<16x768xbf16, #tpu.memory_space<vmem>>, %arg10: memref<16x768xbf16, #tpu.memory_space<vmem>>) attributes {dimension_semantics = [#tpu.dimension_semantics<parallel>], iteration_bounds = array<i64: 2>, scalar_prefetch = 0 : i64, scratch_operands = 2 : i64, tpu.core_type = #tpu.core_type<tc>, window_params = [{transform_indices = @transform_0, window_bounds = array<i64: 1, 16, 768>}, {pipeline_mode = #tpu.pipeline_mode<synchronous>, transform_indices = @transform_1, window_bounds = array<i64: 16, 144>}, {pipeline_mode = #tpu.pipeline_mode<synchronous>, transform_indices = @transform_2, window_bounds = array<i64: 16, 144>}, {pipeline_mode = #tpu.pipeline_mode<synchronous>, transform_indices = @transform_3, window_bounds = array<i64: 16, 64>}, {pipeline_mode = #tpu.pipeline_mode<synchronous>, transform_indices = @transform_4, window_bounds = array<i64: 8, 48>}, {pipeline_mode = #tpu.pipeline_mode<synchronous>, transform_indices = @transform_5, window_bounds = array<i64: 4, 16, 4>}, {pipeline_mode = #tpu.pipeline_mode<synchronous>, transform_indices = @transform_6, window_bounds = array<i64: 1, 512>}, {transform_indices = @transform_7, window_bounds = array<i64: 1, 8, 512>}]} {
    %cst = arith.constant 0.000000e+00 : bf16
    %0 = vector.broadcast %cst : bf16 to vector<16x128xbf16>
    %c0 = arith.constant 0 : index
    %c0_0 = arith.constant 0 : index
    %1 = vector.load %arg9[%c0, %c0_0] : memref<16x768xbf16, #tpu.memory_space<vmem>>, vector<16x128xbf16>
    tpu.vector_store %arg9[%c0, %c0_0], %0 {strides = array<i32>} : memref<16x768xbf16, #tpu.memory_space<vmem>>, vector<16x128xbf16>,
    %c0_1 = arith.constant 0 : index
    %c640 = arith.constant 640 : index
    %2 = vector.load %arg9[%c0_1, %c640] : memref<16x768xbf16, #tpu.memory_space<vmem>>, vector<16x128xbf16>
    tpu.vector_store %arg9[%c0_1, %c640], %0 {strides = array<i32>} : memref<16x768xbf16, #tpu.memory_space<vmem>>, vector<16x128xbf16>,
    %c0_2 = arith.constant 0 : index
    %c0_3 = arith.constant 0 : index
    %3 = vector.load %arg10[%c0_2, %c0_3] : memref<16x768xbf16, #tpu.memory_space<vmem>>, vector<16x128xbf16>
    tpu.vector_store %arg10[%c0_2, %c0_3], %0 {strides = array<i32>} : memref<16x768xbf16, #tpu.memory_space<vmem>>, vector<16x128xbf16>,
    %c0_4 = arith.constant 0 : index
    %c640_5 = arith.constant 640 : index
    %4 = vector.load %arg10[%c0_4, %c640_5] : memref<16x768xbf16, #tpu.memory_space<vmem>>, vector<16x128xbf16>
    tpu.vector_store %arg10[%c0_4, %c640_5], %0 {strides = array<i32>} : memref<16x768xbf16, #tpu.memory_space<vmem>>, vector<16x128xbf16>,
    %c0_6 = arith.constant 0 : index
    %c0_7 = arith.constant 0 : index
    %c0_8 = arith.constant 0 : index
    %5 = vector.load %arg6[%c0_6, %c0_7, %c0_8] : memref<4x16x4xf32, #tpu.memory_space<vmem>>, vector<1x16x4xf32>
    %6 = vector.shape_cast %5 : vector<1x16x4xf32> to vector<16x4xf32>
    %7 = vector.extract_strided_slice %6 {offsets = [0, 0], sizes = [16, 1], strides = [1, 1]} : vector<16x4xf32> to vector<16x1xf32>
    %8 = vector.shape_cast %7 : vector<16x1xf32> to vector<16x1xf32>
    %9 = vector.broadcast %8 : vector<16x1xf32> to vector<16x512xf32>
    %10 = vector.extract_strided_slice %6 {offsets = [0, 1], sizes = [16, 1], strides = [1, 1]} : vector<16x4xf32> to vector<16x1xf32>
    %11 = vector.shape_cast %10 : vector<16x1xf32> to vector<16x1xf32>
    %12 = vector.broadcast %11 : vector<16x1xf32> to vector<16x512xf32>
    %13 = vector.extract_strided_slice %6 {offsets = [0, 2], sizes = [16, 1], strides = [1, 1]} : vector<16x4xf32> to vector<16x1xf32>
    %14 = vector.shape_cast %13 : vector<16x1xf32> to vector<16x1xf32>
    %15 = vector.broadcast %14 : vector<16x1xf32> to vector<16x512xf32>
    %16 = vector.extract_strided_slice %6 {offsets = [0, 3], sizes = [16, 1], strides = [1, 1]} : vector<16x4xf32> to vector<16x1xf32>
    %17 = vector.shape_cast %16 : vector<16x1xf32> to vector<16x1xf32>
    %18 = vector.broadcast %17 : vector<16x1xf32> to vector<16x512xf32>
    %c1 = arith.constant 1 : index
    %c0_9 = arith.constant 0 : index
    %c0_10 = arith.constant 0 : index
    %19 = vector.load %arg6[%c1, %c0_9, %c0_10] : memref<4x16x4xf32, #tpu.memory_space<vmem>>, vector<1x16x4xf32>
    %20 = vector.shape_cast %19 : vector<1x16x4xf32> to vector<16x4xf32>
    %21 = vector.extract_strided_slice %20 {offsets = [0, 0], sizes = [16, 1], strides = [1, 1]} : vector<16x4xf32> to vector<16x1xf32>
    %22 = vector.shape_cast %21 : vector<16x1xf32> to vector<16x1xf32>
    %23 = vector.broadcast %22 : vector<16x1xf32> to vector<16x512xf32>
    %24 = vector.extract_strided_slice %20 {offsets = [0, 1], sizes = [16, 1], strides = [1, 1]} : vector<16x4xf32> to vector<16x1xf32>
    %25 = vector.shape_cast %24 : vector<16x1xf32> to vector<16x1xf32>
    %26 = vector.broadcast %25 : vector<16x1xf32> to vector<16x512xf32>
    %27 = vector.extract_strided_slice %20 {offsets = [0, 2], sizes = [16, 1], strides = [1, 1]} : vector<16x4xf32> to vector<16x1xf32>
    %28 = vector.shape_cast %27 : vector<16x1xf32> to vector<16x1xf32>
    %29 = vector.broadcast %28 : vector<16x1xf32> to vector<16x512xf32>
    %30 = vector.extract_strided_slice %20 {offsets = [0, 3], sizes = [16, 1], strides = [1, 1]} : vector<16x4xf32> to vector<16x1xf32>
    %31 = vector.shape_cast %30 : vector<16x1xf32> to vector<16x1xf32>
    %32 = vector.broadcast %31 : vector<16x1xf32> to vector<16x512xf32>
    %c2 = arith.constant 2 : index
    %c0_11 = arith.constant 0 : index
    %c0_12 = arith.constant 0 : index
    %33 = vector.load %arg6[%c2, %c0_11, %c0_12] : memref<4x16x4xf32, #tpu.memory_space<vmem>>, vector<1x16x4xf32>
    %34 = vector.shape_cast %33 : vector<1x16x4xf32> to vector<16x4xf32>
    %35 = vector.extract_strided_slice %34 {offsets = [0, 0], sizes = [16, 1], strides = [1, 1]} : vector<16x4xf32> to vector<16x1xf32>
    %36 = vector.shape_cast %35 : vector<16x1xf32> to vector<16x1xf32>
    %37 = vector.broadcast %36 : vector<16x1xf32> to vector<16x512xf32>
    %38 = vector.extract_strided_slice %34 {offsets = [0, 1], sizes = [16, 1], strides = [1, 1]} : vector<16x4xf32> to vector<16x1xf32>
    %39 = vector.shape_cast %38 : vector<16x1xf32> to vector<16x1xf32>
    %40 = vector.broadcast %39 : vector<16x1xf32> to vector<16x512xf32>
    %41 = vector.extract_strided_slice %34 {offsets = [0, 2], sizes = [16, 1], strides = [1, 1]} : vector<16x4xf32> to vector<16x1xf32>
    %42 = vector.shape_cast %41 : vector<16x1xf32> to vector<16x1xf32>
    %43 = vector.broadcast %42 : vector<16x1xf32> to vector<16x512xf32>
    %44 = vector.extract_strided_slice %34 {offsets = [0, 3], sizes = [16, 1], strides = [1, 1]} : vector<16x4xf32> to vector<16x1xf32>
    %45 = vector.shape_cast %44 : vector<16x1xf32> to vector<16x1xf32>
    %46 = vector.broadcast %45 : vector<16x1xf32> to vector<16x512xf32>
    %c3 = arith.constant 3 : index
    %c0_13 = arith.constant 0 : index
    %c0_14 = arith.constant 0 : index
    %47 = vector.load %arg6[%c3, %c0_13, %c0_14] : memref<4x16x4xf32, #tpu.memory_space<vmem>>, vector<1x16x4xf32>
    %48 = vector.shape_cast %47 : vector<1x16x4xf32> to vector<16x4xf32>
    %49 = vector.extract_strided_slice %48 {offsets = [0, 0], sizes = [8, 1], strides = [1, 1]} : vector<16x4xf32> to vector<8x1xf32>
    %50 = vector.shape_cast %49 : vector<8x1xf32> to vector<8x1xf32>
    %51 = vector.broadcast %50 : vector<8x1xf32> to vector<8x512xf32>
    %52 = vector.extract_strided_slice %48 {offsets = [0, 1], sizes = [8, 1], strides = [1, 1]} : vector<16x4xf32> to vector<8x1xf32>
    %53 = vector.shape_cast %52 : vector<8x1xf32> to vector<8x1xf32>
    %54 = vector.broadcast %53 : vector<8x1xf32> to vector<8x512xf32>
    %55 = vector.extract_strided_slice %48 {offsets = [0, 2], sizes = [8, 1], strides = [1, 1]} : vector<16x4xf32> to vector<8x1xf32>
    %56 = vector.shape_cast %55 : vector<8x1xf32> to vector<8x1xf32>
    %57 = vector.broadcast %56 : vector<8x1xf32> to vector<8x512xf32>
    %58 = vector.extract_strided_slice %48 {offsets = [0, 3], sizes = [8, 1], strides = [1, 1]} : vector<16x4xf32> to vector<8x1xf32>
    %59 = vector.shape_cast %58 : vector<8x1xf32> to vector<8x1xf32>
    %60 = vector.broadcast %59 : vector<8x1xf32> to vector<8x512xf32>
    %c0_15 = arith.constant 0 : index
    %c0_16 = arith.constant 0 : index
    %61 = vector.load %arg7[%c0_15, %c0_16] : memref<1x512xf32, #tpu.memory_space<vmem>>, vector<1x512xf32>
    %c0_17 = arith.constant 0 : index
    %c0_18 = arith.constant 0 : index
    %c107 = arith.constant 107 : index
    %62 = vector.load %arg1[%c0_17, %c0_18, %c107] : memref<1x16x768xbf16, #tpu.memory_space<vmem>>, vector<1x16x512xbf16>
    %63 = vector.shape_cast %62 : vector<1x16x512xbf16> to vector<16x512xbf16>
    %c0_19 = arith.constant 0 : index
    %c0_20 = arith.constant 0 : index
    %c108 = arith.constant 108 : index
    %64 = vector.load %arg1[%c0_19, %c0_20, %c108] : memref<1x16x768xbf16, #tpu.memory_space<vmem>>, vector<1x16x512xbf16>
    %65 = vector.shape_cast %64 : vector<1x16x512xbf16> to vector<16x512xbf16>
    %c0_21 = arith.constant 0 : index
    %c0_22 = arith.constant 0 : index
    %c109 = arith.constant 109 : index
    %66 = vector.load %arg1[%c0_21, %c0_22, %c109] : memref<1x16x768xbf16, #tpu.memory_space<vmem>>, vector<1x16x512xbf16>
    %67 = vector.shape_cast %66 : vector<1x16x512xbf16> to vector<16x512xbf16>
    %c0_23 = arith.constant 0 : index
    %c0_24 = arith.constant 0 : index
    %c127 = arith.constant 127 : index
    %68 = vector.load %arg1[%c0_23, %c0_24, %c127] : memref<1x16x768xbf16, #tpu.memory_space<vmem>>, vector<1x16x512xbf16>
    %69 = vector.shape_cast %68 : vector<1x16x512xbf16> to vector<16x512xbf16>
    %c0_25 = arith.constant 0 : index
    %c0_26 = arith.constant 0 : index
    %c128 = arith.constant 128 : index
    %70 = vector.load %arg1[%c0_25, %c0_26, %c128] : memref<1x16x768xbf16, #tpu.memory_space<vmem>>, vector<1x16x512xbf16>
    %71 = vector.shape_cast %70 : vector<1x16x512xbf16> to vector<16x512xbf16>
    %c0_27 = arith.constant 0 : index
    %c0_28 = arith.constant 0 : index
    %c129 = arith.constant 129 : index
    %72 = vector.load %arg1[%c0_27, %c0_28, %c129] : memref<1x16x768xbf16, #tpu.memory_space<vmem>>, vector<1x16x512xbf16>
    %73 = vector.shape_cast %72 : vector<1x16x512xbf16> to vector<16x512xbf16>
    %c0_29 = arith.constant 0 : index
    %c0_30 = arith.constant 0 : index
    %c147 = arith.constant 147 : index
    %74 = vector.load %arg1[%c0_29, %c0_30, %c147] : memref<1x16x768xbf16, #tpu.memory_space<vmem>>, vector<1x16x512xbf16>
    %75 = vector.shape_cast %74 : vector<1x16x512xbf16> to vector<16x512xbf16>
    %c0_31 = arith.constant 0 : index
    %c0_32 = arith.constant 0 : index
    %c148 = arith.constant 148 : index
    %76 = vector.load %arg1[%c0_31, %c0_32, %c148] : memref<1x16x768xbf16, #tpu.memory_space<vmem>>, vector<1x16x512xbf16>
    %77 = vector.shape_cast %76 : vector<1x16x512xbf16> to vector<16x512xbf16>
    %c0_33 = arith.constant 0 : index
    %c0_34 = arith.constant 0 : index
    %c149 = arith.constant 149 : index
    %78 = vector.load %arg1[%c0_33, %c0_34, %c149] : memref<1x16x768xbf16, #tpu.memory_space<vmem>>, vector<1x16x512xbf16>
    %79 = vector.shape_cast %78 : vector<1x16x512xbf16> to vector<16x512xbf16>
    %80 = tpu.concatenate %63, %65, %67, %69, %71, %73, %75, %77, %79 in 0 : vector<16x512xbf16>, vector<16x512xbf16>, vector<16x512xbf16>, vector<16x512xbf16>, vector<16x512xbf16>, vector<16x512xbf16>, vector<16x512xbf16>, vector<16x512xbf16>, vector<16x512xbf16> -> vector<144x512xbf16>
    %c0_35 = arith.constant 0 : index
    %c0_36 = arith.constant 0 : index
    %81 = vector.load %arg2[%c0_35, %c0_36] : memref<16x144xbf16, #tpu.memory_space<vmem>>, vector<16x144xbf16>
    %cst_37 = arith.constant dense<0.000000e+00> : vector<16x512xf32>
    %82 = tpu.matmul %81, %80, %cst_37 {dimension_numbers = #tpu.dot_dimension_numbers<[1], [0], [0], [1], [0, 0, 1, 1], [], []>} : vector<16x144xbf16>, vector<144x512xbf16>, vector<16x512xf32> -> vector<16x512xf32>
    %83 = arith.addf %82, %9 : vector<16x512xf32>
    %cst_38 = arith.constant 0.000000e+00 : f32
    %84 = vector.broadcast %cst_38 : f32 to vector<16x512xf32>
    %85 = arith.cmpf oge, %83, %84 : vector<16x512xf32>
    %86 = arith.select %85, %12, %15 : vector<16x512xi1>, vector<16x512xf32>
    %87 = arith.mulf %86, %83 : vector<16x512xf32>
    %88 = arith.addf %87, %18 : vector<16x512xf32>
    %89 = vector.broadcast %61 : vector<1x512xf32> to vector<16x512xf32>
    %90 = arith.mulf %88, %89 : vector<16x512xf32>
    %91 = arith.truncf %90 : vector<16x512xf32> to vector<16x512xbf16>
    %c0_39 = arith.constant 0 : index
    %c128_40 = arith.constant 128 : index
    %92 = vector.load %arg9[%c0_39, %c128_40] : memref<16x768xbf16, #tpu.memory_space<vmem>>, vector<16x512xbf16>
    tpu.vector_store %arg9[%c0_39, %c128_40], %91 {strides = array<i32>} : memref<16x768xbf16, #tpu.memory_space<vmem>>, vector<16x512xbf16>,
    %c0_41 = arith.constant 0 : index
    %c0_42 = arith.constant 0 : index
    %93 = vector.load %arg7[%c0_41, %c0_42] : memref<1x512xf32, #tpu.memory_space<vmem>>, vector<1x512xf32>
    %c0_43 = arith.constant 0 : index
    %c86 = arith.constant 86 : index
    %94 = vector.load %arg9[%c0_43, %c86] : memref<16x768xbf16, #tpu.memory_space<vmem>>, vector<16x512xbf16>
    %c0_44 = arith.constant 0 : index
    %c88 = arith.constant 88 : index
    %95 = vector.load %arg9[%c0_44, %c88] : memref<16x768xbf16, #tpu.memory_space<vmem>>, vector<16x512xbf16>
    %c0_45 = arith.constant 0 : index
    %c90 = arith.constant 90 : index
    %96 = vector.load %arg9[%c0_45, %c90] : memref<16x768xbf16, #tpu.memory_space<vmem>>, vector<16x512xbf16>
    %c0_46 = arith.constant 0 : index
    %c126 = arith.constant 126 : index
    %97 = vector.load %arg9[%c0_46, %c126] : memref<16x768xbf16, #tpu.memory_space<vmem>>, vector<16x512xbf16>
    %c0_47 = arith.constant 0 : index
    %c128_48 = arith.constant 128 : index
    %98 = vector.load %arg9[%c0_47, %c128_48] : memref<16x768xbf16, #tpu.memory_space<vmem>>, vector<16x512xbf16>
    %c0_49 = arith.constant 0 : index
    %c130 = arith.constant 130 : index
    %99 = vector.load %arg9[%c0_49, %c130] : memref<16x768xbf16, #tpu.memory_space<vmem>>, vector<16x512xbf16>
    %c0_50 = arith.constant 0 : index
    %c166 = arith.constant 166 : index
    %100 = vector.load %arg9[%c0_50, %c166] : memref<16x768xbf16, #tpu.memory_space<vmem>>, vector<16x512xbf16>
    %c0_51 = arith.constant 0 : index
    %c168 = arith.constant 168 : index
    %101 = vector.load %arg9[%c0_51, %c168] : memref<16x768xbf16, #tpu.memory_space<vmem>>, vector<16x512xbf16>
    %c0_52 = arith.constant 0 : index
    %c170 = arith.constant 170 : index
    %102 = vector.load %arg9[%c0_52, %c170] : memref<16x768xbf16, #tpu.memory_space<vmem>>, vector<16x512xbf16>
    %103 = tpu.concatenate %94, %95, %96, %97, %98, %99, %100, %101, %102 in 0 : vector<16x512xbf16>, vector<16x512xbf16>, vector<16x512xbf16>, vector<16x512xbf16>, vector<16x512xbf16>, vector<16x512xbf16>, vector<16x512xbf16>, vector<16x512xbf16>, vector<16x512xbf16> -> vector<144x512xbf16>
    %c0_53 = arith.constant 0 : index
    %c0_54 = arith.constant 0 : index
    %104 = vector.load %arg3[%c0_53, %c0_54] : memref<16x144xbf16, #tpu.memory_space<vmem>>, vector<16x144xbf16>
    %cst_55 = arith.constant dense<0.000000e+00> : vector<16x512xf32>
    %105 = tpu.matmul %104, %103, %cst_55 {dimension_numbers = #tpu.dot_dimension_numbers<[1], [0], [0], [1], [0, 0, 1, 1], [], []>} : vector<16x144xbf16>, vector<144x512xbf16>, vector<16x512xf32> -> vector<16x512xf32>
    %106 = arith.addf %105, %23 : vector<16x512xf32>
    %cst_56 = arith.constant 0.000000e+00 : f32
    %107 = vector.broadcast %cst_56 : f32 to vector<16x512xf32>
    %108 = arith.cmpf oge, %106, %107 : vector<16x512xf32>
    %109 = arith.select %108, %26, %29 : vector<16x512xi1>, vector<16x512xf32>
    %110 = arith.mulf %109, %106 : vector<16x512xf32>
    %111 = arith.addf %110, %32 : vector<16x512xf32>
    %112 = vector.broadcast %93 : vector<1x512xf32> to vector<16x512xf32>
    %113 = arith.mulf %111, %112 : vector<16x512xf32>
    %114 = arith.truncf %113 : vector<16x512xf32> to vector<16x512xbf16>
    %c0_57 = arith.constant 0 : index
    %c128_58 = arith.constant 128 : index
    %115 = vector.load %arg10[%c0_57, %c128_58] : memref<16x768xbf16, #tpu.memory_space<vmem>>, vector<16x512xbf16>
    tpu.vector_store %arg10[%c0_57, %c128_58], %114 {strides = array<i32>} : memref<16x768xbf16, #tpu.memory_space<vmem>>, vector<16x512xbf16>,
    %c0_59 = arith.constant 0 : index
    %c107_60 = arith.constant 107 : index
    %116 = vector.load %arg10[%c0_59, %c107_60] : memref<16x768xbf16, #tpu.memory_space<vmem>>, vector<16x512xbf16>
    %c0_61 = arith.constant 0 : index
    %c109_62 = arith.constant 109 : index
    %117 = vector.load %arg10[%c0_61, %c109_62] : memref<16x768xbf16, #tpu.memory_space<vmem>>, vector<16x512xbf16>
    %c0_63 = arith.constant 0 : index
    %c147_64 = arith.constant 147 : index
    %118 = vector.load %arg10[%c0_63, %c147_64] : memref<16x768xbf16, #tpu.memory_space<vmem>>, vector<16x512xbf16>
    %c0_65 = arith.constant 0 : index
    %c149_66 = arith.constant 149 : index
    %119 = vector.load %arg10[%c0_65, %c149_66] : memref<16x768xbf16, #tpu.memory_space<vmem>>, vector<16x512xbf16>
    %120 = tpu.concatenate %116, %117, %118, %119 in 0 : vector<16x512xbf16>, vector<16x512xbf16>, vector<16x512xbf16>, vector<16x512xbf16> -> vector<64x512xbf16>
    %c0_67 = arith.constant 0 : index
    %c0_68 = arith.constant 0 : index
    %121 = vector.load %arg4[%c0_67, %c0_68] : memref<16x64xbf16, #tpu.memory_space<vmem>>, vector<16x64xbf16>
    %cst_69 = arith.constant dense<0.000000e+00> : vector<16x512xf32>
    %122 = tpu.matmul %121, %120, %cst_69 {dimension_numbers = #tpu.dot_dimension_numbers<[1], [0], [0], [1], [0, 0, 1, 1], [], []>} : vector<16x64xbf16>, vector<64x512xbf16>, vector<16x512xf32> -> vector<16x512xf32>
    %123 = arith.addf %122, %37 : vector<16x512xf32>
    %cst_70 = arith.constant 0.000000e+00 : f32
    %124 = vector.broadcast %cst_70 : f32 to vector<16x512xf32>
    %125 = arith.cmpf oge, %123, %124 : vector<16x512xf32>
    %126 = arith.select %125, %40, %43 : vector<16x512xi1>, vector<16x512xf32>
    %127 = arith.mulf %126, %123 : vector<16x512xf32>
    %128 = arith.addf %127, %46 : vector<16x512xf32>
    %c0_71 = arith.constant 0 : index
    %c128_72 = arith.constant 128 : index
    %129 = vector.load %arg9[%c0_71, %c128_72] : memref<16x768xbf16, #tpu.memory_space<vmem>>, vector<16x512xbf16>
    %c0_73 = arith.constant 0 : index
    %c128_74 = arith.constant 128 : index
    %130 = vector.load %arg10[%c0_73, %c128_74] : memref<16x768xbf16, #tpu.memory_space<vmem>>, vector<16x512xbf16>
    %131 = arith.truncf %128 : vector<16x512xf32> to vector<16x512xbf16>
    %132 = tpu.concatenate %129, %130, %131 in 0 : vector<16x512xbf16>, vector<16x512xbf16>, vector<16x512xbf16> -> vector<48x512xbf16>
    %c0_75 = arith.constant 0 : index
    %c0_76 = arith.constant 0 : index
    %133 = vector.load %arg5[%c0_75, %c0_76] : memref<8x48xbf16, #tpu.memory_space<vmem>>, vector<8x48xbf16>
    %cst_77 = arith.constant dense<0.000000e+00> : vector<8x512xf32>
    %134 = tpu.matmul %133, %132, %cst_77 {dimension_numbers = #tpu.dot_dimension_numbers<[1], [0], [0], [1], [0, 0, 1, 1], [], []>} : vector<8x48xbf16>, vector<48x512xbf16>, vector<8x512xf32> -> vector<8x512xf32>
    %135 = arith.addf %134, %51 : vector<8x512xf32>
    %cst_78 = arith.constant 0.000000e+00 : f32
    %136 = vector.broadcast %cst_78 : f32 to vector<8x512xf32>
    %137 = arith.cmpf oge, %135, %136 : vector<8x512xf32>
    %138 = arith.select %137, %54, %57 : vector<8x512xi1>, vector<8x512xf32>
    %139 = arith.mulf %138, %135 : vector<8x512xf32>
    %140 = arith.addf %139, %60 : vector<8x512xf32>
    %c0_79 = arith.constant 0 : index
    %c0_80 = arith.constant 0 : index
    %c0_81 = arith.constant 0 : index
    %141 = vector.load %arg8[%c0_79, %c0_80, %c0_81] : memref<1x8x512xf32, #tpu.memory_space<vmem>>, vector<1x8x512xf32>
    %142 = vector.shape_cast %141 : vector<1x8x512xf32> to vector<8x512xf32>
    %143 = vector.shape_cast %140 : vector<8x512xf32> to vector<1x8x512xf32>
    tpu.vector_store %arg8[%c0_79, %c0_80, %c0_81], %143 {strides = array<i32>} : memref<1x8x512xf32, #tpu.memory_space<vmem>>, vector<1x8x512xf32>,
    return
  }
  func.func @transform_0(%arg0: i32) -> (i32, i32, i32) {
    %c0_i32 = arith.constant 0 : i32
    %c0_i32_0 = arith.constant 0 : i32
    %c0_i32_1 = arith.constant 0 : i32
    return %arg0, %c0_i32, %c0_i32_0 : i32, i32, i32
  }
  func.func @transform_1(%arg0: i32) -> (i32, i32) {
    %c0_i32 = arith.constant 0 : i32
    %c0_i32_0 = arith.constant 0 : i32
    %c0_i32_1 = arith.constant 0 : i32
    return %c0_i32, %c0_i32_0 : i32, i32
  }
  func.func @transform_2(%arg0: i32) -> (i32, i32) {
    %c0_i32 = arith.constant 0 : i32
    %c0_i32_0 = arith.constant 0 : i32
    %c0_i32_1 = arith.constant 0 : i32
    return %c0_i32, %c0_i32_0 : i32, i32
  }
  func.func @transform_3(%arg0: i32) -> (i32, i32) {
    %c0_i32 = arith.constant 0 : i32
    %c0_i32_0 = arith.constant 0 : i32
    %c0_i32_1 = arith.constant 0 : i32
    return %c0_i32, %c0_i32_0 : i32, i32
  }
  func.func @transform_4(%arg0: i32) -> (i32, i32) {
    %c0_i32 = arith.constant 0 : i32
    %c0_i32_0 = arith.constant 0 : i32
    %c0_i32_1 = arith.constant 0 : i32
    return %c0_i32, %c0_i32_0 : i32, i32
  }
  func.func @transform_5(%arg0: i32) -> (i32, i32, i32) {
    %c0_i32 = arith.constant 0 : i32
    %c0_i32_0 = arith.constant 0 : i32
    %c0_i32_1 = arith.constant 0 : i32
    %c0_i32_2 = arith.constant 0 : i32
    return %c0_i32, %c0_i32_0, %c0_i32_1 : i32, i32, i32
  }
  func.func @transform_6(%arg0: i32) -> (i32, i32) {
    %c0_i32 = arith.constant 0 : i32
    %c0_i32_0 = arith.constant 0 : i32
    %c0_i32_1 = arith.constant 0 : i32
    return %c0_i32, %c0_i32_0 : i32, i32
  }
  func.func @transform_7(%arg0: i32) -> (i32, i32, i32) {
    %c0_i32 = arith.constant 0 : i32
    %c0_i32_0 = arith.constant 0 : i32
    %c0_i32_1 = arith.constant 0 : i32
    return %arg0, %c0_i32, %c0_i32_0 : i32, i32, i32
  }
}

</mosaic_0001>

<bundles_post_ra>
// kernel: _upblock_forward.1
= control target key start
LH: loop header
LB: loop body
LE: loop exit
PB: predicated region body
PF: predicated region fallthrough
CT: control target
= control target key end

     0   :  { %s2277_s24 = smov 0   ;;  %s2842_s0 = inlined_call_operand.vmem [shape: bf16[2,16,768], index: 0, kind: input, shape index: {}]   ;;  %s2843_s1 = inlined_call_operand.vmem [shape: bf16[16,144], index: 1, kind: input, shape index: {}]   ;;  %s2844_s2 = inlined_call_operand.vmem [shape: bf16[16,144], index: 2, kind: input, shape index: {}]   ;;  %s2845_s3 = inlined_call_operand.vmem [shape: bf16[16,64], index: 3, kind: input, shape index: {}]   ;;  %s2846_s4 = inlined_call_operand.vmem [shape: bf16[8,48], index: 4, kind: input, shape index: {}]   ;;  %s2847_s5 = inlined_call_operand.vmem [shape: f32[4,16,4], index: 5, kind: input, shape index: {}]   ;;  %s2848_s6 = inlined_call_operand.vmem [shape: f32[1,512], index: 6, kind: input, shape index: {}]   ;;  %s2849_s7 = inlined_call_operand.vmem [shape: f32[2,8,512], index: 7, kind: output, shape index: {}]  }
   0x1 LB: > { %s2014_s25 = sadd.s32 4294967295, %s2216_s24   ;;  %p2018_p0 = scmp.ge.s32.totalorder %s2216_s24, 1  ;;  %s2216_s24 = sphi %s2277_s24, %s17_s24  }
   0x2   : > { %p237_p1 = scmp.lt.s32.totalorder %s2216_s24, 3 }
   0x4   : > { %p238_p2 = pnand %p2018_p0, %p237_p1 }
   0x5   : > { %p269_p3 = scmp.lt.s32.totalorder (!%p238_p2), %s2014_s25, 1  ;;  %s2218_s30 = smov (!%p238_p2), 87  }
   0x6   : > { %241 = sbr.rel (%p238_p2) target bundleno = 1851 (0x73b), region = 48  ;;  %s2219_s8 = smov (!%p238_p2), 88  }
   0x7   : > { %s2220_s9 = smov (!%p238_p2), 106   ;;  %s2221_s10 = smov (!%p238_p2), 107  }
   0x8   : > { %s2222_s11 = smov (!%p238_p2), 108   ;;  %s2223_s12 = smov (!%p238_p2), 126  }
   0x9   : > { %s2224_s13 = smov (!%p238_p2), 127   ;;  %s2225_s14 = smov (!%p238_p2), 86  }
   0xa   : > { %s2226_s15 = smov (!%p238_p2), 21   ;;  %s2232_s27 = smov (!%p238_p2), 84  }
   0xb   : > { %s2851_s25 = smov (!%p269_p3, %s2014_s25), 1  ;;  %vm589_vm0 = vcmask 711680   ;;  %vm574_vm1 = vcmask 719872   ;;  %vm559_vm2 = vcmask 867328   ;;  %vm524_vm3 = vcmask 875520   ;;  %s2233_s28 = smov 48  }
   0xc   : > { %s2105_s26 = smul.u32 48, %s2851_s25  ;;  %vm495_vm4 = vcmask 883712   ;;  %vm480_vm5 = vcmask 1031168   ;;  %vm465_vm6 = vcmask 1039360   ;;  %vm604_vm7 = vcmask 703488  }
   0xd   : > { %vm783_vm8 = vcmask 130048   ;;  %vm710_vm9 = vcmask 171008  }
   0xe   : > { %s2291_s29 = scalar_lea.vmem %s2842_s0, %s2105_s26  ;;  %s2231_s26 = smov 46  }
   0xf   : > { %v2159_v0 = vld [vmem:[%s2291_s29 + $0xc] ss:$24 sps:$4 sm:$0xff]   ;;  %v2163_v2 = vld [vmem:[%s2291_s29 + $0x10] ss:$24 sps:$4 sm:$0xff]   ;;  %v2315_v8 = vld [vmem:[%s2291_s29] ss:$24 sps:$4 sm:$0xff]  }
  0x10   : > { %v2161_v1 = vld [vmem:[%s2291_s29 + $0x4] ss:$24 sps:$4 sm:$0xff]   ;;  %583 = vrot.lane.b32.xlu1 %v2159_v0, %s2218_s30  ;;  %v2164_v3 = vld [vmem:[%s2291_s29 + $0x8] ss:$24 sps:$4 sm:$0xff]   ;;  %v2165_v4 = vld [vmem:[%s2291_s29 + $0x14] ss:$24 sps:$4 sm:$0xff]  }
  0x11   : > { %579 = vrot.lane.b32.xlu0 %v2161_v1, %s2218_s30  ;;  %v2304_v5 = vld [vmem:[%s2291_s29 + $0x4] ss:$24 sps:$4 sm:$0xff]   ;;  %v2311_v7 = vld [vmem:[%s2291_s29 + $0x8] ss:$24 sps:$4 sm:$0xff]  }
  0x12   : > { %v2308_v6 = vld [vmem:[%s2291_s29 + $0xc] ss:$24 sps:$4 sm:$0xff]   ;;  %v2319_v9 = vld [vmem:[%s2291_s29 + $0x10] ss:$24 sps:$4 sm:$0xff]   ;;  %s2234_s29 = smov 44  }
  0x14   : > { %585 = vrot.lane.b32.xlu1 %v2163_v2, %s2218_s30 }
  0x15   : > { %581 = vrot.lane.b32.xlu0 %v2164_v3, %s2218_s30 }
  0x18   : > { %564 = vrot.lane.b32.xlu1 %v2161_v1, %s2219_s8 }
  0x19   : > { %587 = vrot.lane.b32.xlu0 %v2165_v4, %s2218_s30 }
  0x1c   : > { %568 = vrot.lane.b32.xlu1 %v2159_v0, %s2219_s8 }
  0x1d   : > { %566 = vrot.lane.b32.xlu0 %v2164_v3, %s2219_s8 }
  0x20   : > { %572 = vrot.lane.b32.xlu1 %v2165_v4, %s2219_s8 }
  0x21   : > { %570 = vrot.lane.b32.xlu0 %v2163_v2, %s2219_s8 }
  0x24   : > { %551 = vrot.lane.b32.xlu1 %v2164_v3, %s2220_s9 }
  0x25   : > { %549 = vrot.lane.b32.xlu0 %v2161_v1, %s2220_s9 }
  0x28   : > { %555 = vrot.lane.b32.xlu1 %v2163_v2, %s2220_s9 }
  0x29   : > { %553 = vrot.lane.b32.xlu0 %v2159_v0, %s2220_s9 }
  0x2c   : > { %516 = vrot.lane.b32.xlu1 %v2161_v1, %s2221_s10 }
  0x2d   : > { %557 = vrot.lane.b32.xlu0 %v2165_v4, %s2220_s9 }
  0x30   : > { %520 = vrot.lane.b32.xlu1 %v2159_v0, %s2221_s10 }
  0x31   : > { %518 = vrot.lane.b32.xlu0 %v2164_v3, %s2221_s10 }
  0x34   : > { %487 = vrot.lane.b32.xlu1 %v2304_v5, %s2222_s11 }
  0x35   : > { %522 = vrot.lane.b32.xlu0 %v2163_v2, %s2221_s10  ;;  %s2235_s10 = smov 124  }
  0x38   : > { %491 = vrot.lane.b32.xlu1 %v2308_v6, %s2222_s11 }
  0x39   : > { %489 = vrot.lane.b32.xlu0 %v2311_v7, %s2222_s11 }
  0x3c   : > { %485 = vrot.lane.b32.xlu1 %v2315_v8, %s2222_s11 }
  0x3d   : > { %493 = vrot.lane.b32.xlu0 %v2319_v9, %s2222_s11  ;;  %s2236_s11 = smov 42  }
  0x40   : > { %474 = vrot.lane.b32.xlu1 %v2311_v7, %s2223_s12 }
  0x41   : > { %472 = vrot.lane.b32.xlu0 %v2304_v5, %s2223_s12 }
  0x44   : > { %478 = vrot.lane.b32.xlu1 %v2319_v9, %s2223_s12 }
  0x45   : > { %476 = vrot.lane.b32.xlu0 %v2308_v6, %s2223_s12 }
  0x48   : > { %457 = vrot.lane.b32.xlu1 %v2304_v5, %s2224_s13 }
  0x49   : > { %470 = vrot.lane.b32.xlu0 %v2315_v8, %s2223_s12 }
  0x4c   : > { %461 = vrot.lane.b32.xlu1 %v2308_v6, %s2224_s13 }
  0x4d   : > { %459 = vrot.lane.b32.xlu0 %v2311_v7, %s2224_s13 }
  0x50   : > { %455 = vrot.lane.b32.xlu1 %v2315_v8, %s2224_s13 }
  0x51   : > { %463 = vrot.lane.b32.xlu0 %v2319_v9, %s2224_s13 }
  0x54   : > { %596 = vrot.lane.b32.xlu1 %v2164_v3, %s2225_s14 }
  0x55   : > { %594 = vrot.lane.b32.xlu0 %v2161_v1, %s2225_s14 }
  0x58   : > { %600 = vrot.lane.b32.xlu1 %v2163_v2, %s2225_s14 }
  0x59   : > { %598 = vrot.lane.b32.xlu0 %v2159_v0, %s2225_s14 }
  0x5d   : > { %602 = vrot.lane.b32.xlu0 %v2165_v4, %s2225_s14 }
  0x82   : > { %v584_v10 = vpop.permute.xlu1 %583 }
  0x83   : > { %v580_v11 = vpop.permute.xlu0 %579 }
  0x84   : > { %690 = vrot.lane.b32.xlu1 %v580_v11, %s2226_s15 }
  0x86   : > { %v586_v12 = vpop.permute.xlu1 %585 }
  0x87   : > { %v582_v13 = vpop.permute.xlu0 %581  ;;  %v592_v31 = vsel %vm589_vm0, %v584_v10, %v586_v12 }
  0x88   : > { %v590_v29 = vsel %vm589_vm0, %v580_v11, %v582_v13  ;;  %v591_v33 = vsel %vm589_vm0, %v582_v13, %v584_v10 }
  0x8a   : > { %v565_v14 = vpop.permute.xlu1 %564 }
  0x8b   : > { %v588_v15 = vpop.permute.xlu0 %587  ;;  %680 = vrot.lane.b32.xlu0 %v565_v14, %s2226_s15 }
  0x8c   : > { %v593_v35 = vsel %vm589_vm0, %v586_v12, %v588_v15  ;;  %v2175_v15 = vld [vmem:[%s2843_s1 + $0x4] ss:$8 sps:$4 sm:$0xff]  }
  0x8d   : > { %2043 = vmatprep.mubr.msk.bf16.mxu0 %vm783_vm8, %v2175_v15  ;;  %2044 = vmatprep.mubr.msk.bf16.mxu1 %vm783_vm8, %v2175_v15 }
  0x8e   : > { %v569_v16 = vpop.permute.xlu1 %568 }
  0x8f   : > { %v567_v17 = vpop.permute.xlu0 %566 }
  0x90   : > { %v576_v34 = vsel %vm574_vm1, %v567_v17, %v569_v16  ;;  %v575_v38 = vsel %vm574_vm1, %v565_v14, %v567_v17  ;;  %v289_v17 = vld [vmem:[%s2847_s5 + $0x8] sm:$0xff] }
  0x92   : > { %v573_v18 = vpop.permute.xlu1 %572 }
  0x93   : > { %v571_v19 = vpop.permute.xlu0 %570 }
  0x94   : > { %v578_v36 = vsel %vm574_vm1, %v571_v19, %v573_v18  ;;  %v577_v41 = vsel %vm574_vm1, %v569_v16, %v571_v19  ;;  %v288_v19 = vld [vmem:[%s2847_s5] sm:$0xff] }
  0x96   : > { %v552_v20 = vpop.permute.xlu1 %551 }
  0x97   : > { %v550_v21 = vpop.permute.xlu0 %549 }
  0x98   : > { %670 = vrot.lane.b32.xlu1 %v550_v21, %s2226_s15  ;;  %v560_v39 = vsel %vm559_vm2, %v550_v21, %v552_v20  ;;  %v2229_v21 = vmov 2  }
  0x9a   : > { %v556_v22 = vpop.permute.xlu1 %555 }
  0x9b   : > { %v554_v23 = vpop.permute.xlu0 %553 }
  0x9c   : > { %v562_v42 = vsel %vm559_vm2, %v554_v23, %v556_v22  ;;  %v561_v44 = vsel %vm559_vm2, %v552_v20, %v554_v23  ;;  %v2228_v20 = vmov 1  }
  0x9e   : > { %v517_v24 = vpop.permute.xlu1 %516 }
  0x9f   : > { %v558_v25 = vpop.permute.xlu0 %557  ;;  %660 = vrot.lane.b32.xlu0 %v517_v24, %s2226_s15 }
  0xa0   : > { %v563_v47 = vsel %vm559_vm2, %v556_v22, %v558_v25  ;;  %v2230_v22 = vmov 3  }
  0xa2   : > { %v521_v32 = vpop.permute.xlu1 %520 }
  0xa3   : > { %v519_v26 = vpop.permute.xlu0 %518 }
  0xa4   : > { %v526_v45 = vsel %vm524_vm3, %v519_v26, %v521_v32  ;;  %v525_v51 = vsel %vm524_vm3, %v517_v24, %v519_v26 }
  0xa6   : > { %v488_v37 = vpop.permute.xlu1 %487 }
  0xa7   : > { %v523_v27 = vpop.permute.xlu0 %522 }
  0xa8   : > { %668 = vrot.lane.b32.xlu1 %v523_v27, %s2226_s15  ;;  %v527_v54 = vsel %vm524_vm3, %v521_v32, %v523_v27  ;;  %vm1131_vm3 = vcmask 375808  }
  0xaa   : > { %v492_v40 = vpop.permute.xlu1 %491 }
  0xab   : > { %v490_v28 = vpop.permute.xlu0 %489 }
  0xac   : > { %692 = vrot.lane.b32.xlu1 %v590_v29, %s2226_s15  ;;  %v497_v48 = vsel %vm495_vm4, %v488_v37, %v490_v28  ;;  %v498_v58 = vsel %vm495_vm4, %v490_v28, %v492_v40 }
  0xae   : > { %v486_v43 = vpop.permute.xlu1 %485 }
  0xaf   : > { %v494_v30 = vpop.permute.xlu0 %493  ;;  %v496_v55 = vsel %vm495_vm4, %v486_v43, %v488_v37 }
  0xb0   : > { %658 = vrot.lane.b32.xlu0 %v494_v30, %s2226_s15  ;;  %696 = vrot.lane.b32.xlu1 %v592_v31, %s2226_s15  ;;  %v499_v52 = vsel %vm495_vm4, %v492_v40, %v494_v30  ;;  %vm1116_vm4 = vcmask 392192  }
  0xb2   : > { %v475_v49 = vpop.permute.xlu1 %474 }
  0xb3   : > { %v473_v46 = vpop.permute.xlu0 %472 }
  0xb4   : > { %694 = vrot.lane.b32.xlu0 %v591_v33, %s2226_s15  ;;  %684 = vrot.lane.b32.xlu1 %v576_v34, %s2226_s15  ;;  %v482_v61 = vsel %vm480_vm5, %v473_v46, %v475_v49 }
  0xb6   : > { %v479_v53 = vpop.permute.xlu1 %478 }
  0xb7   : > { %v477_v50 = vpop.permute.xlu0 %476 }
  0xb8   : > { %698 = vrot.lane.b32.xlu0 %v593_v35, %s2226_s15  ;;  %688 = vrot.lane.b32.xlu1 %v578_v36, %s2226_s15  ;;  %v483_v57 = vsel %vm480_vm5, %v475_v49, %v477_v50  ;;  %v484_v1 = vsel %vm480_vm5, %v477_v50, %v479_v53 }
  0xba   : > { %v458_v59 = vpop.permute.xlu1 %457 }
  0xbb   : > { %v471_v56 = vpop.permute.xlu0 %470 }
  0xbc   : > { %682 = vrot.lane.b32.xlu0 %v575_v38, %s2226_s15  ;;  %672 = vrot.lane.b32.xlu1 %v560_v39, %s2226_s15  ;;  %v481_v3 = vsel %vm480_vm5, %v471_v56, %v473_v46 }
  0xbe   : > { %v462_v63 = vpop.permute.xlu1 %461 }
  0xbf   : > { %v460_v60 = vpop.permute.xlu0 %459 }
  0xc0   : > { %686 = vrot.lane.b32.xlu0 %v577_v41, %s2226_s15  ;;  %676 = vrot.lane.b32.xlu1 %v562_v42, %s2226_s15  ;;  %v467_v62 = vsel %vm465_vm6, %v458_v59, %v460_v60  ;;  %v468_v10 = vsel %vm465_vm6, %v460_v60, %v462_v63 }
  0xc2   : > { %v456_v4 = vpop.permute.xlu1 %455 }
  0xc3   : > { %v464_v0 = vpop.permute.xlu0 %463  ;;  %v466_v11 = vsel %vm465_vm6, %v456_v4, %v458_v59 }
  0xc4   : > { %674 = vrot.lane.b32.xlu0 %v561_v44, %s2226_s15  ;;  %664 = vrot.lane.b32.xlu1 %v526_v45, %s2226_s15  ;;  %v469_v2 = vsel %vm465_vm6, %v462_v63, %v464_v0  ;;  %vm1101_vm6 = vcmask 687104  }
  0xc6   : > { %v597_v12 = vpop.permute.xlu1 %596 }
  0xc7   : > { %v595_v13 = vpop.permute.xlu0 %594 }
  0xc8   : > { %678 = vrot.lane.b32.xlu0 %v563_v47, %s2226_s15  ;;  %652 = vrot.lane.b32.xlu1 %v497_v48, %s2226_s15  ;;  %v605_v14 = vsel %vm604_vm7, %v595_v13, %v597_v12 }
  0xca   : > { %v601_v16 = vpop.permute.xlu1 %600 }
  0xcc   : > { %662 = vrot.lane.b32.xlu0 %v525_v51, %s2226_s15  ;;  %656 = vrot.lane.b32.xlu1 %v499_v52, %s2226_s15 }
  0xd0   : > { %666 = vrot.lane.b32.xlu0 %v527_v54, %s2226_s15  ;;  %650 = vrot.lane.b32.xlu1 %v496_v55, %s2226_s15 }
  0xd4   : > { %654 = vrot.lane.b32.xlu0 %v498_v58, %s2226_s15  ;;  %644 = vrot.lane.b32.xlu1 %v483_v57, %s2226_s15 }
  0xd8   : > { %642 = vrot.lane.b32.xlu0 %v482_v61, %s2226_s15  ;;  %648 = vrot.lane.b32.xlu1 %v479_v53, %s2226_s15 }
  0xdc   : > { %646 = vrot.lane.b32.xlu0 %v484_v1, %s2226_s15  ;;  %632 = vrot.lane.b32.xlu1 %v467_v62, %s2226_s15 }
  0xe0   : > { %640 = vrot.lane.b32.xlu0 %v481_v3, %s2226_s15  ;;  %636 = vrot.lane.b32.xlu1 %v469_v2, %s2226_s15 }
  0xe4   : > { %634 = vrot.lane.b32.xlu0 %v468_v10, %s2226_s15  ;;  %630 = vrot.lane.b32.xlu1 %v466_v11, %s2226_s15 }
  0xe8   : > { %638 = vrot.lane.b32.xlu0 %v464_v0, %s2226_s15  ;;  %624 = vrot.lane.b32.xlu1 %v2311_v7, %s2226_s15  ;;  %v599_v7 = vpop.permute.xlu0 %598 }
  0xec   : > { %622 = vrot.lane.b32.xlu0 %v2304_v5, %s2226_s15  ;;  %628 = vrot.lane.b32.xlu1 %v2319_v9, %s2226_s15  ;;  %v607_v5 = vsel %vm604_vm7, %v599_v7, %v601_v16  ;;  %v2227_v9 = vmov 0  }
  0xed   : > { %2134 = vset.pattern.permute.xlu1 %v2227_v9  ;;  %280 = vst [vmem:[#allocation2] sm:$0xf] %v2227_v9  ;;  %281 = vst [vmem:[#allocation2 + $0x18] sm:$0xf] %v2227_v9  ;;  %2133 = vset.pattern.permute.xlu0 %v2227_v9 }
  0xee   : > { %282 = vst [vmem:[#allocation2 + $0x14] sm:$0xf] %v2227_v9  ;;  %283 = vst [vmem:[#allocation2 + $0x2c] sm:$0xf] %v2227_v9 }
  0xef   : > { %284 = vst [vmem:[#allocation3] sm:$0xf] %v2227_v9  ;;  %285 = vst [vmem:[#allocation3 + $0x18] sm:$0xf] %v2227_v9 }
  0xf0   : > { %626 = vrot.lane.b32.xlu0 %v2308_v6, %s2226_s15  ;;  %702 = vrot.lane.b32.xlu1 %v605_v14, %s2226_s15  ;;  %286 = vst [vmem:[#allocation3 + $0x14] sm:$0xf] %v2227_v9  ;;  %287 = vst [vmem:[#allocation3 + $0x2c] sm:$0xf] %v2227_v9  ;;  %v606_v6 = vsel %vm604_vm7, %v597_v12, %v599_v7 }
  0xf4   : > { %620 = vrot.lane.b32.xlu0 %v2315_v8, %s2226_s15  ;;  %706 = vrot.lane.b32.xlu1 %v607_v5, %s2226_s15  ;;  %v603_v8 = vpop.permute.xlu0 %602 }
  0xf5   : > { %v608_v18 = vsel %vm604_vm7, %v601_v16, %v603_v8 }
  0xf6   : > { %v691_v23 = vpop.permute.xlu1 %690 }
  0xf8   : > { %704 = vrot.lane.b32.xlu0 %v606_v6, %s2226_s15  ;;  %700 = vrot.lane.b32.xlu1 %v595_v13, %s2226_s15 }
  0xfc   : > { %708 = vrot.lane.b32.xlu0 %v608_v18, %s2226_s15  ;;  %297 = vperm.xlu1 %2134, %v289_v17  }
  0xfd   : > { %v681_v25 = vpop.permute.xlu0 %680 }
 0x100   : > { %2135 = vset.pattern.permute.xlu1 %v2228_v20  ;;  %292 = vperm.xlu0 %2133, %v288_v19  }
 0x101   : > { %301 = vperm.xlu1 %2135, %v288_v19  }
 0x104   : > { %2136 = vset.pattern.permute.xlu0 %v2228_v20 }
 0x105   : > { %2137 = vset.pattern.permute.xlu1 %v2229_v21  ;;  %305 = vperm.xlu0 %2136, %v289_v17  }
 0x106   : > { %309 = vperm.xlu1 %2137, %v288_v19  }
 0x109   : > { %2138 = vset.pattern.permute.xlu0 %v2230_v22 }
 0x10a   : > { %313 = vperm.xlu1 %2137, %v289_v17   ;;  %317 = vperm.xlu0 %2138, %v288_v19   ;;  %v671_v24 = vpop.permute.xlu1 %670 }
 0x10e   : > { %2139 = vset.pattern.permute.xlu1 %v2230_v22  ;;  %2141 = vset.pattern.permute.xlu0 %v2227_v9 }
 0x10f   : > { %321 = vperm.xlu1 %2139, %v289_v17  }
 0x111   : > { %v661_v27 = vpop.permute.xlu0 %660 }
 0x113   : > { %2140 = vset.pattern.permute.xlu1 %v2227_v9 }
 0x11a   : > { %v669_v26 = vpop.permute.xlu1 %668 }
 0x11e   : > { %v693_v28 = vpop.permute.xlu1 %692 }
 0x11f   : > { %v739_v34 = vsel %vm710_vm9, %v691_v23, %v693_v28 }
 0x122   : > { %v659_v29 = vpop.permute.xlu0 %658  ;;  %v697_v30 = vpop.permute.xlu1 %696 }
 0x126   : > { %v695_v31 = vpop.permute.xlu0 %694  ;;  %v685_v32 = vpop.permute.xlu1 %684 }
 0x127   : > { %v740_v33 = vsel %vm710_vm9, %v693_v28, %v695_v31  ;;  %v741_v38 = vsel %vm710_vm9, %v695_v31, %v697_v30 }
 0x128   : > { %787 = vmatprep.subr.bf16.mxu0 %v740_v33 }
 0x129   : > { %788 = vmatpush1.bf16.msra.mxu0 %v739_v34 }
 0x12a   : > { %v699_v35 = vpop.permute.xlu0 %698  ;;  %v689_v36 = vpop.permute.xlu1 %688 }
 0x12b   : > { %v742_v37 = vsel %vm710_vm9, %v697_v30, %v699_v35 }
 0x12c   : > { %830 = vmatprep.subr.bf16.mxu1 %v742_v37 }
 0x12d   : > { %831 = vmatpush1.bf16.msra.mxu1 %v741_v38 }
 0x12e   : > { %v683_v39 = vpop.permute.xlu0 %682  ;;  %v673_v40 = vpop.permute.xlu1 %672 }
 0x12f   : > { %v736_v41 = vsel %vm710_vm9, %v683_v39, %v685_v32  ;;  %v735_v42 = vsel %vm710_vm9, %v681_v25, %v683_v39  ;;  %v731_v50 = vsel %vm710_vm9, %v671_v24, %v673_v40 }
 0x130   : > { %789 = vmatprep.subr.bf16.mxu0 %v736_v41  ;;  %v2173_v41 = vld [vmem:[%s2843_s1] ss:$8 sps:$4 sm:$0xff]  }
 0x131   : > { %790 = vmatpush1.bf16.msra.mxu0 %v735_v42 }
 0x132   : > { %v687_v43 = vpop.permute.xlu0 %686  ;;  %v677_v44 = vpop.permute.xlu1 %676 }
 0x133   : > { %v738_v45 = vsel %vm710_vm9, %v687_v43, %v689_v36  ;;  %v737_v46 = vsel %vm710_vm9, %v685_v32, %v687_v43 }
 0x134   : > { %832 = vmatprep.subr.bf16.mxu1 %v738_v45  ;;  %v2176_v45 = vld [vmem:[#allocation2 + $0x14] ss:$24 sps:$4 sm:$0xff]  }
 0x135   : > { %833 = vmatpush1.bf16.msra.mxu1 %v737_v46  ;;  %1129 = vrot.lane.b32.xlu1 %v2176_v45, %s2231_s26 }
 0x136   : > { %v675_v47 = vpop.permute.xlu0 %674  ;;  %v665_v48 = vpop.permute.xlu1 %664  ;;  %1114 = vrot.lane.b32.xlu0 %v2176_v45, %s2233_s28 }
 0x137   : > { %v732_v49 = vsel %vm710_vm9, %v673_v40, %v675_v47  ;;  %v733_v54 = vsel %vm710_vm9, %v675_v47, %v677_v44 }
 0x138   : > { %791 = vmatprep.subr.bf16.mxu0 %v732_v49  ;;  %v906_v49 = vlaneseq }
 0x139   : > { %792 = vmatpush1.bf16.msra.mxu0 %v731_v50  ;;  %1099 = vrot.lane.b32.xlu1 %v2176_v45, %s2232_s27 }
 0x13a   : > { %v679_v51 = vpop.permute.xlu0 %678  ;;  %v653_v52 = vpop.permute.xlu1 %652 }
 0x13b   : > { %v734_v53 = vsel %vm710_vm9, %v677_v44, %v679_v51  ;;  %v2493_v51 = vshrl.u32 %v906_v49, 7 }
 0x13c   : > { %834 = vmatprep.subr.bf16.mxu1 %v734_v53 }
 0x13d   : > { %835 = vmatpush1.bf16.msra.mxu1 %v733_v54  ;;  %1144 = vrot.lane.b32.xlu1 %v2176_v45, %s2234_s29 }
 0x13e   : > { %v663_v55 = vpop.permute.xlu0 %662  ;;  %v657_v56 = vpop.permute.xlu1 %656 }
 0x13f   : > { %v728_v57 = vsel %vm710_vm9, %v663_v55, %v665_v48  ;;  %v727_v58 = vsel %vm710_vm9, %v661_v27, %v663_v55  ;;  %v726_v63 = vsel %vm710_vm9, %v657_v56, %v659_v29 }
 0x140   : > { %793 = vmatprep.subr.bf16.mxu0 %v728_v57  ;;  %v912_v57 = vsub.s32 1, %v2493_v51 }
 0x141   : > { %794 = vmatpush1.bf16.msra.mxu0 %v727_v58  ;;  %v916_v58 = vsub.s32 2, %v2493_v51 }
 0x142   : > { %v667_v59 = vpop.permute.xlu0 %666  ;;  %v651_v60 = vpop.permute.xlu1 %650 }
 0x143   : > { %v730_v61 = vsel %vm710_vm9, %v667_v59, %v669_v26  ;;  %v729_v62 = vsel %vm710_vm9, %v665_v48, %v667_v59  ;;  %v723_v4 = vsel %vm710_vm9, %v651_v60, %v653_v52  ;;  %v417_v60 = vld [vmem:[%s2848_s6] sm:$0xf] }
 0x144   : > { %836 = vmatprep.subr.bf16.mxu1 %v730_v61 }
 0x145   : > { %837 = vmatpush1.bf16.msra.mxu1 %v729_v62 }
 0x146   : > { %v655_v0 = vpop.permute.xlu0 %654  ;;  %838 = vmatprep.subr.bf16.mxu1 %v726_v63  ;;  %v645_v1 = vpop.permute.xlu1 %644 }
 0x147   : > { %v724_v2 = vsel %vm710_vm9, %v653_v52, %v655_v0  ;;  %v725_v3 = vsel %vm710_vm9, %v655_v0, %v657_v56  ;;  %v908_v56 = vsub.s32 0, %v2493_v51 }
 0x148   : > { %795 = vmatprep.subr.bf16.mxu0 %v724_v2 }
 0x149   : > { %796 = vmatpush1.bf16.msra.mxu0 %v723_v4  ;;  %839 = vmatpush1.bf16.msra.mxu1 %v725_v3 }
 0x14a   : > { %v643_v10 = vpop.permute.xlu0 %642  ;;  %v649_v11 = vpop.permute.xlu1 %648 }
 0x14b   : > { %v720_v12 = vsel %vm710_vm9, %v643_v10, %v645_v1 }
 0x14c   : > { %797 = vmatprep.subr.bf16.mxu0 %v720_v12  ;;  %v909_v12 = vrot.slane %v417_v60, %v908_v56 }
 0x14e   : > { %v647_v13 = vpop.permute.xlu0 %646  ;;  %v633_v14 = vpop.permute.xlu1 %632 }
 0x14f   : > { %v722_v15 = vsel %vm710_vm9, %v647_v13, %v649_v11  ;;  %v721_v16 = vsel %vm710_vm9, %v645_v1, %v647_v13  ;;  %v920_v1 = vsub.s32 3, %v2493_v51  ;;  %v913_v13 = vrot.slane %v417_v60, %v912_v57 }
 0x150   : > { %840 = vmatprep.subr.bf16.mxu1 %v722_v15 }
 0x151   : > { %841 = vmatpush1.bf16.msra.mxu1 %v721_v16  ;;  %v917_v16 = vrot.slane %v417_v60, %v916_v58 }
 0x152   : > { %v641_v7 = vpop.permute.xlu0 %640  ;;  %v637_v5 = vpop.permute.xlu1 %636 }
 0x153   : > { %v719_v6 = vsel %vm710_vm9, %v641_v7, %v643_v10 }
 0x154   : > { %798 = vmatpush1.bf16.msra.mxu0 %v719_v6 }
 0x156   : > { %v635_v8 = vpop.permute.xlu0 %634  ;;  %v631_v17 = vpop.permute.xlu1 %630 }
 0x157   : > { %v716_v18 = vsel %vm710_vm9, %v633_v14, %v635_v8  ;;  %v715_v19 = vsel %vm710_vm9, %v631_v17, %v633_v14  ;;  %v717_v26 = vsel %vm710_vm9, %v635_v8, %v637_v5 }
 0x158   : > { %799 = vmatprep.subr.bf16.mxu0 %v716_v18 }
 0x159   : > { %800 = vmatpush1.bf16.msra.mxu0 %v715_v19 }
 0x15a   : > { %v639_v23 = vpop.permute.xlu0 %638  ;;  %v625_v24 = vpop.permute.xlu1 %624 }
 0x15b   : > { %v718_v25 = vsel %vm710_vm9, %v637_v5, %v639_v23 }
 0x15c   : > { %842 = vmatprep.subr.bf16.mxu1 %v718_v25 }
 0x15d   : > { %843 = vmatpush1.bf16.msra.mxu1 %v717_v26  ;;  %v921_v26 = vrot.slane %v417_v60, %v920_v1 }
 0x15e   : > { %v623_v27 = vpop.permute.xlu0 %622  ;;  %v629_v28 = vpop.permute.xlu1 %628 }
 0x15f   : > { %v712_v29 = vsel %vm710_vm9, %v623_v27, %v625_v24 }
 0x160   : > { %801 = vmatprep.subr.bf16.mxu0 %v712_v29 }
 0x162   : > { %v627_v30 = vpop.permute.xlu0 %626  ;;  %v703_v31 = vpop.permute.xlu1 %702 }
 0x163   : > { %v714_v32 = vsel %vm710_vm9, %v627_v30, %v629_v28  ;;  %v713_v33 = vsel %vm710_vm9, %v625_v24, %v627_v30 }
 0x164   : > { %844 = vmatprep.subr.bf16.mxu1 %v714_v32 }
 0x165   : > { %845 = vmatpush1.bf16.msra.mxu1 %v713_v33 }
 0x166   : > { %v621_v34 = vpop.permute.xlu0 %620  ;;  %v707_v35 = vpop.permute.xlu1 %706 }
 0x167   : > { %v711_v36 = vsel %vm710_vm9, %v621_v34, %v623_v27 }
 0x168   : > { %802 = vmatpush1.bf16.msra.mxu0 %v711_v36 }
 0x16a   : > { %v705_v37 = vpop.permute.xlu0 %704  ;;  %v701_v38 = vpop.permute.xlu1 %700 }
 0x16b   : > { %v744_v39 = vsel %vm710_vm9, %v703_v31, %v705_v37  ;;  %v743_v40 = vsel %vm710_vm9, %v701_v38, %v703_v31  ;;  %v745_v44 = vsel %vm710_vm9, %v705_v37, %v707_v35 }
 0x16c   : > { %817 = vmatprep.subr.bf16.mxu0 %v744_v39 }
 0x16d   : > { %818 = vmatpush2.bf16.msra.mxu0 %v743_v40 }
 0x16e   : > { %v709_v42 = vpop.permute.xlu0 %708 }
 0x16f   : > { %v746_v43 = vsel %vm710_vm9, %v707_v35, %v709_v42 }
 0x170   : > { %820 = vmatmul.mubr.bf16.vlgmr.msra.gmra.mxu0 %v2173_v41  ;;  %860 = vmatprep.subr.bf16.mxu1 %v746_v43 }
 0x171   : > { %861 = vmatpush2.bf16.msra.mxu1 %v745_v44 }
 0x174   : > { %863 = vmatmul.mubr.bf16.vlgmr.msra.gmra.mxu1 %v2173_v41 }
 0x177   : > { %v298_v46 = vpop.permute.xlu1 %297 }
 0x17b   : > { %v293_v47 = vpop.permute.xlu0 %292 }
 0x17c   : > { %v302_v48 = vpop.permute.xlu1 %301 }
 0x180   : > { %v2491_v50 = vpop.permute.xlu0 %305 }
 0x181   : > { %v310_v52 = vpop.permute.xlu1 %309 }
 0x185   : > { %v318_v61 = vpop.permute.xlu0 %317  ;;  %v314_v3 = vpop.permute.xlu1 %313 }
 0x18a   : > { %v322_v30 = vpop.permute.xlu1 %321 }
 0x230   : > { %v821_v53 = vpop.f32.mrf.mxu0 }
 0x231   : > { %v822_v54 = vadd.f32 %v821_v53, %v293_v47 }
 0x232   : > { %v823_v55 = vpop.f32.mrf.mxu0 }
 0x233   : > { %vm873_vm10 = vcmp.ge.f32.partialorder %v822_v54, 0.0  ;;  %v824_v59 = vadd.f32 %v823_v55, %v293_v47 }
 0x234   : > { %v881_v62 = vsel %vm873_vm10, %v302_v48, %v310_v52  ;;  %v825_v63 = vpop.f32.mrf.mxu0  ;;  %v864_v0 = vpop.f32.mrf.mxu1  ;;  %vm1024_vm10 = vcmask 1014784  }
 0x235   : > { %v889_v2 = vmul.f32 %v881_v62, %v822_v54  ;;  %vm874_vm11 = vcmp.ge.f32.partialorder %v824_v59, 0.0  ;;  %v826_v4 = vadd.f32 %v825_v63, %v298_v46  ;;  %v865_v10 = vadd.f32 %v864_v0, %v293_v47 }
 0x236   : > { %v882_v11 = vsel %vm874_vm11, %v302_v48, %v310_v52  ;;  %v827_v14 = vpop.f32.mrf.mxu0  ;;  %v866_v15 = vpop.f32.mrf.mxu1  ;;  %vm1146_vm11 = vcmask 359424  }
 0x237   : > { %v890_v7 = vmul.f32 %v882_v11, %v824_v59  ;;  %vm877_vm12 = vcmp.ge.f32.partialorder %v826_v4, 0.0  ;;  %vm875_vm13 = vcmp.ge.f32.partialorder %v865_v10, 0.0  ;;  %v897_v5 = vadd.f32 %v889_v2, %v318_v61  ;;  %v2183_v11 = vld [vmem:[#allocation2] ss:$24 sps:$4 sm:$0xff]  }
 0x238   : > { %v885_v6 = vsel %vm877_vm12, %v2491_v50, %v314_v3  ;;  %v883_v8 = vsel %vm875_vm13, %v302_v48, %v310_v52  ;;  %v828_v17 = vadd.f32 %v827_v14, %v298_v46  ;;  %v867_v18 = vadd.f32 %v866_v15, %v293_v47  ;;  %v868_v19 = vpop.f32.mrf.mxu1  ;;  %v1115_v14 = vpop.permute.xlu0 %1114 }
 0x239   : > { %v893_v23 = vmul.f32 %v885_v6, %v826_v4  ;;  %v891_v24 = vmul.f32 %v883_v8, %v865_v10  ;;  %v898_v25 = vadd.f32 %v890_v7, %v318_v61  ;;  %v926_v27 = vmul.f32 %v909_v12, %v897_v5 }
 0x23a   : > { %vm878_vm14 = vcmp.ge.f32.partialorder %v828_v17, 0.0  ;;  %vm876_vm15 = vcmp.ge.f32.partialorder %v867_v18, 0.0  ;;  %v869_v28 = vadd.f32 %v868_v19, %v298_v46  ;;  %v870_v29 = vpop.f32.mrf.mxu1 }
 0x23b   : > { %v899_v31 = vadd.f32 %v891_v24, %v318_v61  ;;  %v927_v32 = vmul.f32 %v913_v13, %v898_v25  ;;  %v886_v33 = vsel %vm878_vm14, %v2491_v50, %v314_v3  ;;  %v884_v34 = vsel %vm876_vm15, %v302_v48, %v310_v52 }
 0x23c   : > { %v894_v35 = vmul.f32 %v886_v33, %v828_v17  ;;  %v892_v36 = vmul.f32 %v884_v34, %v867_v18  ;;  %vm879_vm0 = vcmp.ge.f32.partialorder %v869_v28, 0.0  ;;  %v871_v37 = vadd.f32 %v870_v29, %v298_v46 }
 0x23d   : > { %v2097_v38 = vpack.c.bf16 %v927_v32, %v926_v27  ;;  %v887_v39 = vsel %vm879_vm0, %v2491_v50, %v314_v3  ;;  %v901_v40 = vadd.f32 %v893_v23, %v322_v30  ;;  %v928_v44 = vmul.f32 %v917_v16, %v899_v31 }
 0x23e   : > { %v900_v41 = vadd.f32 %v892_v36, %v318_v61  ;;  %v895_v42 = vmul.f32 %v887_v39, %v869_v28  ;;  %vm880_vm2 = vcmp.ge.f32.partialorder %v871_v37, 0.0  ;;  %v902_v43 = vadd.f32 %v894_v35, %v322_v30 }
 0x23f   : > { %958 = vst [vmem:[#allocation2 + $0x4] sm:$0xff] %v2097_v38  ;;  %v888_v45 = vsel %vm880_vm2, %v2491_v50, %v314_v3  ;;  %v930_v47 = vmul.f32 %v909_v12, %v901_v40  ;;  %v1130_v12 = vpop.permute.xlu1 %1129 }
 0x240   : > { %v929_v49 = vmul.f32 %v921_v26, %v900_v41  ;;  %v896_v53 = vmul.f32 %v888_v45, %v871_v37  ;;  %v903_v48 = vadd.f32 %v895_v42, %v322_v30  ;;  %v931_v52 = vmul.f32 %v913_v13, %v902_v43 }
 0x241   : > { %v2203_v62 = vpack.c.bf16 %v930_v47, %v926_v27 }
 0x242   : > { %v2098_v54 = vpack.c.bf16 %v929_v49, %v928_v44  ;;  %v904_v55 = vadd.f32 %v896_v53, %v322_v30  ;;  %v2099_v46 = vpack.c.bf16 %v931_v52, %v930_v47  ;;  %v932_v59 = vmul.f32 %v917_v16, %v903_v48 }
 0x243   : > { %v2202_v61 = vpack.c.bf16 %v931_v52, %v927_v32  ;;  %1121 = vrot.lane.b32.xlu1 %v2203_v62, %s2231_s26  ;;  %v2549_v13 = vpop.permute.xlu1 %1099 }
 0x244   : > { %959 = vst [vmem:[#allocation2 + $0xc] sm:$0xff] %v2098_v54  ;;  %v933_v60 = vmul.f32 %v921_v26, %v904_v55  ;;  %960 = vst [vmem:[#allocation2 + $0x1c] sm:$0xff] %v2099_v46  ;;  %v2205_v0 = vpack.c.bf16 %v932_v59, %v928_v44 }
 0x245   : > { %1123 = vrot.lane.b32.xlu0 %v2202_v61, %s2231_s26 }
 0x246   : > { %v2100_v63 = vpack.c.bf16 %v933_v60, %v932_v59  ;;  %v2204_v50 = vpack.c.bf16 %v933_v60, %v929_v49 }
 0x247   : > { %1125 = vrot.lane.b32.xlu1 %v2205_v0, %s2231_s26  ;;  %v2551_v15 = vpop.permute.xlu1 %1144 }
 0x248   : > { %961 = vst [vmem:[#allocation2 + $0x24] sm:$0xff] %v2100_v63 }
 0x249   : > { %1127 = vrot.lane.b32.xlu0 %v2204_v50, %s2231_s26 }
 0x24b   : > { %1108 = vrot.lane.b32.xlu1 %v2202_v61, %s2233_s28  ;;  %v2177_v2 = vld [vmem:[#allocation2 + $0x8] ss:$24 sps:$4 sm:$0xff]   ;;  %v2179_v3 = vld [vmem:[#allocation2 + $0x4] ss:$24 sps:$4 sm:$0xff]  }
 0x24d   : > { %1106 = vrot.lane.b32.xlu0 %v2203_v62, %s2233_s28 }
 0x24f   : > { %1112 = vrot.lane.b32.xlu1 %v2204_v50, %s2233_s28  ;;  %v2181_v4 = vld [vmem:[#allocation2 + $0x10] ss:$24 sps:$4 sm:$0xff]   ;;  %v2182_v10 = vld [vmem:[#allocation2 + $0xc] ss:$24 sps:$4 sm:$0xff]  }
 0x251   : > { %1110 = vrot.lane.b32.xlu0 %v2205_v0, %s2233_s28 }
 0x253   : > { %1091 = vrot.lane.b32.xlu1 %v2203_v62, %s2232_s27 }
 0x255   : > { %1093 = vrot.lane.b32.xlu0 %v2202_v61, %s2232_s27 }
 0x257   : > { %1095 = vrot.lane.b32.xlu1 %v2205_v0, %s2232_s27 }
 0x259   : > { %1097 = vrot.lane.b32.xlu0 %v2204_v50, %s2232_s27 }
 0x25b   : > { %1061 = vrot.lane.b32.xlu1 %v2202_v61, %s2225_s14 }
 0x25d   : > { %1059 = vrot.lane.b32.xlu0 %v2203_v62, %s2225_s14 }
 0x25f   : > { %1065 = vrot.lane.b32.xlu1 %v2204_v50, %s2225_s14 }
 0x261   : > { %1063 = vrot.lane.b32.xlu0 %v2205_v0, %s2225_s14 }
 0x263   : > { %1033 = vrot.lane.b32.xlu1 %v2177_v2, %s2219_s8 }
 0x265   : > { %1031 = vrot.lane.b32.xlu0 %v2179_v3, %s2219_s8 }
 0x267   : > { %1037 = vrot.lane.b32.xlu1 %v2181_v4, %s2219_s8 }
 0x269   : > { %1035 = vrot.lane.b32.xlu0 %v2182_v10, %s2219_s8 }
 0x26b   : > { %1016 = vrot.lane.b32.xlu1 %v2179_v3, %s2235_s10 }
 0x26d   : > { %1029 = vrot.lane.b32.xlu0 %v2183_v11, %s2219_s8 }
 0x26f   : > { %1020 = vrot.lane.b32.xlu1 %v2182_v10, %s2235_s10 }
 0x271   : > { %1018 = vrot.lane.b32.xlu0 %v2177_v2, %s2235_s10 }
 0x273   : > { %1014 = vrot.lane.b32.xlu1 %v2183_v11, %s2235_s10 }
 0x275   : > { %1022 = vrot.lane.b32.xlu0 %v2181_v4, %s2235_s10 }
 0x277   : > { %1004 = vrot.lane.b32.xlu1 %v2177_v2, %s2223_s12 }
 0x279   : > { %1002 = vrot.lane.b32.xlu0 %v2179_v3, %s2223_s12 }
 0x27b   : > { %1008 = vrot.lane.b32.xlu1 %v2181_v4, %s2223_s12 }
 0x27d   : > { %1006 = vrot.lane.b32.xlu0 %v2182_v10, %s2223_s12 }
 0x27f   : > { %1136 = vrot.lane.b32.xlu1 %v2203_v62, %s2234_s29 }
 0x281   : > { %1000 = vrot.lane.b32.xlu0 %v2183_v11, %s2223_s12 }
 0x283   : > { %1140 = vrot.lane.b32.xlu1 %v2205_v0, %s2234_s29 }
 0x285   : > { %1138 = vrot.lane.b32.xlu0 %v2202_v61, %s2234_s29 }
 0x287   : > { %1164 = vrot.lane.b32.xlu1 %v2179_v3, %s2236_s11 }
 0x289   : > { %1142 = vrot.lane.b32.xlu0 %v2204_v50, %s2234_s29 }
 0x28b   : > { %1168 = vrot.lane.b32.xlu1 %v2182_v10, %s2236_s11 }
 0x28d   : > { %1166 = vrot.lane.b32.xlu0 %v2177_v2, %s2236_s11 }
 0x28f   : > { %1162 = vrot.lane.b32.xlu1 %v2183_v11, %s2236_s11 }
 0x291   : > { %1170 = vrot.lane.b32.xlu0 %v2181_v4, %s2236_s11 }
 0x2b5   : > { %v1122_v7 = vpop.permute.xlu1 %1121 }
 0x2b6   : > { %1232 = vrot.lane.b32.xlu0 %v1122_v7, %s2236_s11 }
 0x2b7   : > { %v1124_v16 = vpop.permute.xlu0 %1123 }
 0x2b8   : > { %v1132_v42 = vsel %vm1131_vm3, %v1122_v7, %v1124_v16 }
 0x2b9   : > { %v1126_v6 = vpop.permute.xlu1 %1125 }
 0x2ba   : > { %v1133_v47 = vsel %vm1131_vm3, %v1124_v16, %v1126_v6 }
 0x2bb   : > { %v1128_v5 = vpop.permute.xlu0 %1127 }
 0x2bc   : > { %v1134_v44 = vsel %vm1131_vm3, %v1126_v6, %v1128_v5  ;;  %v1135_v53 = vsel %vm1131_vm3, %v1128_v5, %v1130_v12 }
 0x2bd   : > { %v1109_v17 = vpop.permute.xlu1 %1108 }
 0x2bf   : > { %v1107_v8 = vpop.permute.xlu0 %1106 }
 0x2c0   : > { %1222 = vrot.lane.b32.xlu1 %v1107_v8, %s2236_s11  ;;  %v1117_v52 = vsel %vm1116_vm4, %v1107_v8, %v1109_v17 }
 0x2c1   : > { %v1113_v19 = vpop.permute.xlu1 %1112 }
 0x2c2   : > { %v1120_v49 = vsel %vm1116_vm4, %v1113_v19, %v1115_v14 }
 0x2c3   : > { %v1111_v18 = vpop.permute.xlu0 %1110 }
 0x2c4   : > { %v1118_v45 = vsel %vm1116_vm4, %v1109_v17, %v1111_v18  ;;  %v1119_v55 = vsel %vm1116_vm4, %v1111_v18, %v1113_v19  ;;  %v2184_v17 = vld [vmem:[%s2844_s2 + $0x4] ss:$8 sps:$4 sm:$0xff]  }
 0x2c5   : > { %v1092_v24 = vpop.permute.xlu1 %1091  ;;  %2065 = vmatprep.mubr.msk.bf16.mxu0 %vm783_vm8, %v2184_v17  ;;  %2066 = vmatprep.mubr.msk.bf16.mxu1 %vm783_vm8, %v2184_v17  ;;  %vm1252_vm8 = vcmask 343040  }
 0x2c6   : > { %1212 = vrot.lane.b32.xlu0 %v1092_v24, %s2236_s11 }
 0x2c7   : > { %v1094_v23 = vpop.permute.xlu0 %1093 }
 0x2c8   : > { %v1102_v48 = vsel %vm1101_vm6, %v1092_v24, %v1094_v23 }
 0x2c9   : > { %v1096_v26 = vpop.permute.xlu1 %1095 }
 0x2ca   : > { %v1103_v59 = vsel %vm1101_vm6, %v1094_v23, %v1096_v26 }
 0x2cb   : > { %v1098_v25 = vpop.permute.xlu0 %1097 }
 0x2cc   : > { %v1104_v54 = vsel %vm1101_vm6, %v1096_v26, %v1098_v25  ;;  %v1105_v61 = vsel %vm1101_vm6, %v1098_v25, %v2549_v13 }
 0x2cd   : > { %v1062_v28 = vpop.permute.xlu1 %1061 }
 0x2cf   : > { %v1060_v27 = vpop.permute.xlu0 %1059 }
 0x2d0   : > { %1202 = vrot.lane.b32.xlu1 %v1060_v27, %s2236_s11  ;;  %v1067_v63 = vsel %vm604_vm7, %v1060_v27, %v1062_v28 }
 0x2d1   : > { %v1066_v30 = vpop.permute.xlu1 %1065 }
 0x2d2   : > { %1210 = vrot.lane.b32.xlu0 %v1066_v30, %s2236_s11 }
 0x2d3   : > { %v1064_v29 = vpop.permute.xlu0 %1063 }
 0x2d4   : > { %v1068_v46 = vsel %vm604_vm7, %v1062_v28, %v1064_v29  ;;  %v1069_v2 = vsel %vm604_vm7, %v1064_v29, %v1066_v30  ;;  %v2022_v28 = vld [vmem:[%s2847_s5 + $0x10] sm:$0xff]  ;;  %v2023_v29 = vld [vmem:[%s2847_s5 + $0x18] sm:$0xff] }
 0x2d5   : > { %v1034_v32 = vpop.permute.xlu1 %1033 }
 0x2d7   : > { %v1032_v31 = vpop.permute.xlu0 %1031 }
 0x2d8   : > { %v1040_v60 = vsel %vm574_vm1, %v1032_v31, %v1034_v32 }
 0x2d9   : > { %v1038_v34 = vpop.permute.xlu1 %1037 }
 0x2da   : > { %1200 = vrot.lane.b32.xlu1 %v1038_v34, %s2236_s11 }
 0x2db   : > { %v1036_v33 = vpop.permute.xlu0 %1035 }
 0x2dc   : > { %v1042_v62 = vsel %vm574_vm1, %v1036_v33, %v1038_v34  ;;  %v1041_v10 = vsel %vm574_vm1, %v1034_v32, %v1036_v33 }
 0x2dd   : > { %v2559_v36 = vpop.permute.xlu1 %1016 }
 0x2df   : > { %v1030_v35 = vpop.permute.xlu0 %1029 }
 0x2e0   : > { %v1039_v0 = vsel %vm574_vm1, %v1030_v35, %v1032_v31 }
 0x2e1   : > { %v1021_v38 = vpop.permute.xlu1 %1020 }
 0x2e3   : > { %v1019_v37 = vpop.permute.xlu0 %1018 }
 0x2e4   : > { %v1027_v4 = vsel %vm1024_vm10, %v1019_v37, %v1021_v38  ;;  %v1026_v12 = vsel %vm1024_vm10, %v2559_v36, %v1019_v37 }
 0x2e5   : > { %v2561_v40 = vpop.permute.xlu1 %1014 }
 0x2e6   : > { %v1025_v6 = vsel %vm1024_vm10, %v2561_v40, %v2559_v36 }
 0x2e7   : > { %v1023_v39 = vpop.permute.xlu0 %1022 }
 0x2e8   : > { %1190 = vrot.lane.b32.xlu0 %v1023_v39, %s2236_s11  ;;  %v1028_v16 = vsel %vm1024_vm10, %v1021_v38, %v1023_v39 }
 0x2e9   : > { %v2564_v41 = vpop.permute.xlu1 %1004 }
 0x2eb   : > { %v1003_v50 = vpop.permute.xlu0 %1002 }
 0x2ec   : > { %1234 = vrot.lane.b32.xlu0 %v1132_v42, %s2236_s11  ;;  %v1011_v11 = vsel %vm480_vm5, %v1003_v50, %v2564_v41 }
 0x2ed   : > { %v1009_v43 = vpop.permute.xlu1 %1008 }
 0x2ee   : > { %1180 = vrot.lane.b32.xlu1 %v1009_v43, %s2236_s11 }
 0x2ef   : > { %v1007_v3 = vpop.permute.xlu0 %1006 }
 0x2f0   : > { %1238 = vrot.lane.b32.xlu0 %v1134_v44, %s2236_s11  ;;  %v1013_v14 = vsel %vm480_vm5, %v1007_v3, %v1009_v43  ;;  %v1012_v19 = vsel %vm480_vm5, %v2564_v41, %v1007_v3 }
 0x2f1   : > { %v1137_v7 = vpop.permute.xlu1 %1136 }
 0x2f2   : > { %1236 = vrot.lane.b32.xlu1 %v1133_v47, %s2236_s11 }
 0x2f3   : > { %v1001_v13 = vpop.permute.xlu0 %1000 }
 0x2f4   : > { %1226 = vrot.lane.b32.xlu0 %v1118_v45, %s2236_s11  ;;  %v1010_v8 = vsel %vm480_vm5, %v1001_v13, %v1003_v50 }
 0x2f5   : > { %v1141_v23 = vpop.permute.xlu1 %1140 }
 0x2f6   : > { %1240 = vrot.lane.b32.xlu1 %v1135_v53, %s2236_s11 }
 0x2f7   : > { %v1139_v5 = vpop.permute.xlu0 %1138 }
 0x2f8   : > { %1230 = vrot.lane.b32.xlu0 %v1120_v49, %s2236_s11  ;;  %v1147_v18 = vsel %vm1146_vm11, %v1137_v7, %v1139_v5  ;;  %v1148_v26 = vsel %vm1146_vm11, %v1139_v5, %v1141_v23 }
 0x2f9   : > { %v2648_v30 = vpop.permute.xlu1 %1164 }
 0x2fa   : > { %1224 = vrot.lane.b32.xlu1 %v1117_v52, %s2236_s11 }
 0x2fb   : > { %v1143_v24 = vpop.permute.xlu0 %1142 }
 0x2fc   : > { %1214 = vrot.lane.b32.xlu0 %v1102_v48, %s2236_s11  ;;  %v1149_v25 = vsel %vm1146_vm11, %v1141_v23, %v1143_v24  ;;  %v1150_v27 = vsel %vm1146_vm11, %v1143_v24, %v2551_v15 }
 0x2fd   : > { %v2653_v32 = vpop.permute.xlu1 %1168 }
 0x2fe   : > { %1228 = vrot.lane.b32.xlu1 %v1119_v55, %s2236_s11 }
 0x2ff   : > { %v2646_v15 = vpop.permute.xlu0 %1166 }
 0x300   : > { %1218 = vrot.lane.b32.xlu0 %v1104_v54, %s2236_s11 }
 0x301   : > { %v2655_v34 = vpop.permute.xlu1 %1162 }
 0x302   : > { %1216 = vrot.lane.b32.xlu1 %v1103_v59, %s2236_s11 }
 0x303   : > { %v2651_v31 = vpop.permute.xlu0 %1170 }
 0x304   : > { %1206 = vrot.lane.b32.xlu0 %v1068_v46, %s2236_s11 }
 0x306   : > { %1220 = vrot.lane.b32.xlu1 %v1105_v61, %s2236_s11 }
 0x308   : > { %1194 = vrot.lane.b32.xlu0 %v1040_v60, %s2236_s11 }
 0x30a   : > { %1204 = vrot.lane.b32.xlu1 %v1067_v63, %s2236_s11 }
 0x30c   : > { %1198 = vrot.lane.b32.xlu0 %v1042_v62, %s2236_s11 }
 0x30e   : > { %1208 = vrot.lane.b32.xlu1 %v1069_v2, %s2236_s11 }
 0x310   : > { %1192 = vrot.lane.b32.xlu0 %v1039_v0, %s2236_s11 }
 0x312   : > { %1196 = vrot.lane.b32.xlu1 %v1041_v10, %s2236_s11 }
 0x314   : > { %1186 = vrot.lane.b32.xlu0 %v1027_v4, %s2236_s11 }
 0x316   : > { %1184 = vrot.lane.b32.xlu1 %v1026_v12, %s2236_s11 }
 0x318   : > { %1174 = vrot.lane.b32.xlu0 %v1011_v11, %s2236_s11 }
 0x31a   : > { %1188 = vrot.lane.b32.xlu1 %v1028_v16, %s2236_s11 }
 0x31c   : > { %1178 = vrot.lane.b32.xlu0 %v1013_v14, %s2236_s11 }
 0x31e   : > { %1182 = vrot.lane.b32.xlu1 %v1025_v6, %s2236_s11 }
 0x320   : > { %1172 = vrot.lane.b32.xlu0 %v1010_v8, %s2236_s11 }
 0x322   : > { %1176 = vrot.lane.b32.xlu1 %v1012_v19, %s2236_s11 }
 0x324   : > { %1244 = vrot.lane.b32.xlu0 %v1147_v18, %s2236_s11 }
 0x326   : > { %1246 = vrot.lane.b32.xlu1 %v1148_v26, %s2236_s11 }
 0x328   : > { %1248 = vrot.lane.b32.xlu0 %v1149_v25, %s2236_s11  ;;  %v1233_v33 = vpop.permute.xlu0 %1232 }
 0x32a   : > { %1250 = vrot.lane.b32.xlu1 %v1150_v27, %s2236_s11 }
 0x32c   : > { %1242 = vrot.lane.b32.xlu0 %v1137_v7, %s2236_s11  ;;  %s2096_s11 = sshll.u32 %s2851_s25, 5 }
 0x32d   : > { %s278_s17 = scalar_lea.vmem %s2849_s7, %s2096_s11 }
 0x32e   : > { %329 = vperm.xlu1 %2140, %v2022_v28  }
 0x330   : > { %334 = vperm.xlu0 %2141, %v2023_v29  }
 0x332   : > { %2142 = vset.pattern.permute.xlu1 %v2228_v20  ;;  %v1223_v36 = vpop.permute.xlu1 %1222 }
 0x333   : > { %338 = vperm.xlu1 %2142, %v2022_v28  }
 0x334   : > { %2143 = vset.pattern.permute.xlu0 %v2229_v21 }
 0x335   : > { %346 = vperm.xlu0 %2143, %v2022_v28  }
 0x337   : > { %342 = vperm.xlu1 %2142, %v2023_v29  }
 0x338   : > { %v1213_v35 = vpop.permute.xlu0 %1212 }
 0x339   : > { %2146 = vset.pattern.permute.xlu0 %v2230_v22 }
 0x33a   : > { %358 = vperm.xlu0 %2146, %v2023_v29  }
 0x33b   : > { %2144 = vset.pattern.permute.xlu1 %v2229_v21 }
 0x33c   : > { %350 = vperm.xlu1 %2144, %v2023_v29  }
 0x33e   : > { %2148 = vset.pattern.permute.xlu0 %v2227_v9 }
 0x340   : > { %2145 = vset.pattern.permute.xlu1 %v2230_v22 }
 0x341   : > { %354 = vperm.xlu1 %2145, %v2022_v28  }
 0x342   : > { %v1203_v38 = vpop.permute.xlu1 %1202 }
 0x344   : > { %v1211_v37 = vpop.permute.xlu0 %1210 }
 0x345   : > { %2147 = vset.pattern.permute.xlu1 %v2227_v9 }
 0x34c   : > { %v1201_v40 = vpop.permute.xlu1 %1200 }
 0x35a   : > { %v2657_v39 = vpop.permute.xlu0 %1190 }
 0x35e   : > { %v1235_v41 = vpop.permute.xlu0 %1234 }
 0x35f   : > { %v1281_v49 = vsel %vm1252_vm8, %v1233_v33, %v1235_v41 }
 0x360   : > { %v2659_v43 = vpop.permute.xlu1 %1180 }
 0x362   : > { %v1239_v42 = vpop.permute.xlu0 %1238 }
 0x364   : > { %v1237_v45 = vpop.permute.xlu1 %1236 }
 0x365   : > { %v1282_v47 = vsel %vm1252_vm8, %v1235_v41, %v1237_v45  ;;  %v1283_v54 = vsel %vm1252_vm8, %v1237_v45, %v1239_v42 }
 0x366   : > { %v1227_v44 = vpop.permute.xlu0 %1226  ;;  %1328 = vmatprep.subr.bf16.mxu0 %v1282_v47 }
 0x367   : > { %1329 = vmatpush1.bf16.msra.mxu0 %v1281_v49 }
 0x368   : > { %v1241_v48 = vpop.permute.xlu1 %1240 }
 0x369   : > { %v1284_v52 = vsel %vm1252_vm8, %v1239_v42, %v1241_v48 }
 0x36a   : > { %v1231_v53 = vpop.permute.xlu0 %1230  ;;  %1371 = vmatprep.subr.bf16.mxu1 %v1284_v52 }
 0x36b   : > { %1372 = vmatpush1.bf16.msra.mxu1 %v1283_v54 }
 0x36c   : > { %v1225_v46 = vpop.permute.xlu1 %1224 }
 0x36d   : > { %v1277_v59 = vsel %vm1252_vm8, %v1223_v36, %v1225_v46  ;;  %v1278_v60 = vsel %vm1252_vm8, %v1225_v46, %v1227_v44  ;;  %v1253_v46 = vsel %vm1252_vm8, %v2655_v34, %v2648_v30 }
 0x36e   : > { %v1215_v55 = vpop.permute.xlu0 %1214  ;;  %1330 = vmatprep.subr.bf16.mxu0 %v1278_v60 }
 0x36f   : > { %1331 = vmatpush1.bf16.msra.mxu0 %v1277_v59  ;;  %v1273_v4 = vsel %vm1252_vm8, %v1213_v35, %v1215_v55 }
 0x370   : > { %v1229_v62 = vpop.permute.xlu1 %1228 }
 0x371   : > { %v1279_v63 = vsel %vm1252_vm8, %v1227_v44, %v1229_v62  ;;  %v1280_v50 = vsel %vm1252_vm8, %v1229_v62, %v1231_v53 }
 0x372   : > { %v1219_v61 = vpop.permute.xlu0 %1218  ;;  %1373 = vmatprep.subr.bf16.mxu1 %v1280_v50 }
 0x373   : > { %1374 = vmatpush1.bf16.msra.mxu1 %v1279_v63 }
 0x374   : > { %v1217_v2 = vpop.permute.xlu1 %1216 }
 0x375   : > { %v1274_v3 = vsel %vm1252_vm8, %v1215_v55, %v1217_v2  ;;  %v1275_v13 = vsel %vm1252_vm8, %v1217_v2, %v1219_v61  ;;  %v1255_v55 = vsel %vm1252_vm8, %v2646_v15, %v2653_v32 }
 0x376   : > { %v1207_v0 = vpop.permute.xlu0 %1206  ;;  %1332 = vmatprep.subr.bf16.mxu0 %v1274_v3  ;;  %v962_v3 = vld [vmem:[%s2848_s6] sm:$0xf] }
 0x377   : > { %1333 = vmatpush1.bf16.msra.mxu0 %v1273_v4 }
 0x378   : > { %v1221_v11 = vpop.permute.xlu1 %1220 }
 0x379   : > { %v1276_v12 = vsel %vm1252_vm8, %v1219_v61, %v1221_v11 }
 0x37a   : > { %v1195_v10 = vpop.permute.xlu0 %1194  ;;  %1375 = vmatprep.subr.bf16.mxu1 %v1276_v12 }
 0x37b   : > { %1376 = vmatpush1.bf16.msra.mxu1 %v1275_v13 }
 0x37c   : > { %v1205_v16 = vpop.permute.xlu1 %1204 }
 0x37d   : > { %v1269_v7 = vsel %vm1252_vm8, %v1203_v38, %v1205_v16  ;;  %v1270_v5 = vsel %vm1252_vm8, %v1205_v16, %v1207_v0 }
 0x37e   : > { %v1199_v14 = vpop.permute.xlu0 %1198  ;;  %1334 = vmatprep.subr.bf16.mxu0 %v1270_v5  ;;  %v1458_v5 = vrot.slane %v962_v3, %v916_v58 }
 0x37f   : > { %1335 = vmatpush1.bf16.msra.mxu0 %v1269_v7  ;;  %v1268_v19 = vsel %vm1252_vm8, %v1199_v14, %v1201_v40  ;;  %v1450_v7 = vrot.slane %v962_v3, %v908_v56 }
 0x380   : > { %v1209_v8 = vpop.permute.xlu1 %1208 }
 0x381   : > { %v1271_v17 = vsel %vm1252_vm8, %v1207_v0, %v1209_v8  ;;  %v1272_v18 = vsel %vm1252_vm8, %v1209_v8, %v1211_v37 }
 0x382   : > { %v1193_v6 = vpop.permute.xlu0 %1192  ;;  %1377 = vmatprep.subr.bf16.mxu1 %v1272_v18 }
 0x383   : > { %1378 = vmatpush1.bf16.msra.mxu1 %v1271_v17  ;;  %v1265_v27 = vsel %vm1252_vm8, %v1193_v6, %v1195_v10 }
 0x384   : > { %1379 = vmatprep.subr.bf16.mxu1 %v1268_v19  ;;  %v1197_v24 = vpop.permute.xlu1 %1196 }
 0x385   : > { %v1267_v25 = vsel %vm1252_vm8, %v1197_v24, %v1199_v14  ;;  %v1266_v26 = vsel %vm1252_vm8, %v1195_v10, %v1197_v24  ;;  %v1454_v24 = vrot.slane %v962_v3, %v912_v57 }
 0x386   : > { %v1187_v23 = vpop.permute.xlu0 %1186  ;;  %1336 = vmatprep.subr.bf16.mxu0 %v1266_v26 }
 0x387   : > { %1337 = vmatpush1.bf16.msra.mxu0 %v1265_v27  ;;  %1380 = vmatpush1.bf16.msra.mxu1 %v1267_v25  ;;  %v1462_v25 = vrot.slane %v962_v3, %v920_v1 }
 0x388   : > { %v1185_v29 = vpop.permute.xlu1 %1184 }
 0x389   : > { %v1262_v33 = vsel %vm1252_vm8, %v1185_v29, %v1187_v23 }
 0x38a   : > { %v1175_v28 = vpop.permute.xlu0 %1174  ;;  %1338 = vmatprep.subr.bf16.mxu0 %v1262_v33 }
 0x38c   : > { %v1189_v36 = vpop.permute.xlu1 %1188 }
 0x38d   : > { %v1263_v37 = vsel %vm1252_vm8, %v1187_v23, %v1189_v36  ;;  %v1264_v38 = vsel %vm1252_vm8, %v1189_v36, %v2657_v39  ;;  %v1256_v39 = vsel %vm1252_vm8, %v2653_v32, %v2651_v31 }
 0x38e   : > { %v1179_v35 = vpop.permute.xlu0 %1178  ;;  %1381 = vmatprep.subr.bf16.mxu1 %v1264_v38 }
 0x38f   : > { %1382 = vmatpush1.bf16.msra.mxu1 %v1263_v37  ;;  %v1260_v40 = vsel %vm1252_vm8, %v1179_v35, %v2659_v43  ;;  %v1254_v43 = vsel %vm1252_vm8, %v2648_v30, %v2646_v15  ;;  %v2186_v15 = vld [vmem:[%s2844_s2] ss:$8 sps:$4 sm:$0xff]   ;;  %v2187_v30 = vld [vmem:[#allocation3 + $0x14] ss:$24 sps:$4 sm:$0xff]  }
 0x390   : > { %1383 = vmatprep.subr.bf16.mxu1 %v1260_v40  ;;  %v1183_v42 = vpop.permute.xlu1 %1182  ;;  %1593 = vrot.lane.b32.xlu0 %v2187_v30, %s2225_s14 }
 0x391   : > { %v1261_v44 = vsel %vm1252_vm8, %v1183_v42, %v1185_v29  ;;  %1579 = vrot.lane.b32.xlu1 %v2187_v30, %s2219_s8 }
 0x392   : > { %v1173_v41 = vpop.permute.xlu0 %1172  ;;  %1339 = vmatpush1.bf16.msra.mxu0 %v1261_v44 }
 0x393   : > { %v1257_v48 = vsel %vm1252_vm8, %v1173_v41, %v1175_v28 }
 0x394   : > { %v1177_v47 = vpop.permute.xlu1 %1176 }
 0x395   : > { %v1259_v49 = vsel %vm1252_vm8, %v1177_v47, %v1179_v35  ;;  %v1258_v53 = vsel %vm1252_vm8, %v1175_v28, %v1177_v47 }
 0x396   : > { %v1245_v45 = vpop.permute.xlu0 %1244  ;;  %1340 = vmatprep.subr.bf16.mxu0 %v1258_v53  ;;  %1384 = vmatpush1.bf16.msra.mxu1 %v1259_v49 }
 0x397   : > { %1341 = vmatpush1.bf16.msra.mxu0 %v1257_v48  ;;  %1385 = vmatprep.subr.bf16.mxu1 %v1256_v39 }
 0x398   : > { %1342 = vmatprep.subr.bf16.mxu0 %v1254_v43  ;;  %v1247_v54 = vpop.permute.xlu1 %1246 }
 0x399   : > { %v1286_v31 = vsel %vm1252_vm8, %v1245_v45, %v1247_v54 }
 0x39a   : > { %v1249_v52 = vpop.permute.xlu0 %1248  ;;  %1386 = vmatpush1.bf16.msra.mxu1 %v1255_v55 }
 0x39b   : > { %1343 = vmatpush1.bf16.msra.mxu0 %v1253_v46  ;;  %v1287_v63 = vsel %vm1252_vm8, %v1247_v54, %v1249_v52 }
 0x39c   : > { %1358 = vmatprep.subr.bf16.mxu0 %v1286_v31  ;;  %v1251_v60 = vpop.permute.xlu1 %1250 }
 0x39d   : > { %v1288_v62 = vsel %vm1252_vm8, %v1249_v52, %v1251_v60 }
 0x39e   : > { %v1243_v59 = vpop.permute.xlu0 %1242  ;;  %1401 = vmatprep.subr.bf16.mxu1 %v1288_v62 }
 0x39f   : > { %v1285_v61 = vsel %vm1252_vm8, %v1243_v59, %v1245_v45  ;;  %1402 = vmatpush2.bf16.msra.mxu1 %v1287_v63 }
 0x3a0   : > { %1359 = vmatpush2.bf16.msra.mxu0 %v1285_v61 }
 0x3a2   : > { %1404 = vmatmul.mubr.bf16.vlgmr.msra.gmra.mxu1 %v2186_v15 }
 0x3a3   : > { %1361 = vmatmul.mubr.bf16.vlgmr.msra.gmra.mxu0 %v2186_v15  ;;  %1757 = vmatprep.mubr.bf16.mxu1 %v2227_v9 }
 0x3a4   : > { %1714 = vmatprep.mubr.bf16.mxu0 %v2227_v9 }
 0x3a9   : > { %v330_v32 = vpop.permute.xlu1 %329 }
 0x3ab   : > { %v335_v0 = vpop.permute.xlu0 %334 }
 0x3ae   : > { %v339_v34 = vpop.permute.xlu1 %338 }
 0x3b0   : > { %v347_v13 = vpop.permute.xlu0 %346 }
 0x3b2   : > { %v343_v50 = vpop.permute.xlu1 %342 }
 0x3b5   : > { %v359_v44 = vpop.permute.xlu0 %358 }
 0x3b7   : > { %v351_v2 = vpop.permute.xlu1 %350 }
 0x3bc   : > { %v355_v27 = vpop.permute.xlu1 %354 }
 0x462   : > { %v1405_v10 = vpop.f32.mrf.mxu1 }
 0x463   : > { %v1362_v4 = vpop.f32.mrf.mxu0  ;;  %v1406_v12 = vadd.f32 %v1405_v10, %v330_v32 }
 0x464   : > { %v1363_v11 = vadd.f32 %v1362_v4, %v330_v32  ;;  %v1407_v16 = vpop.f32.mrf.mxu1 }
 0x465   : > { %v1364_v14 = vpop.f32.mrf.mxu0  ;;  %vm1416_vm13 = vcmp.ge.f32.partialorder %v1406_v12, 0.0  ;;  %v1408_v8 = vadd.f32 %v1407_v16, %v330_v32  ;;  %v2193_v16 = vld [vmem:[#allocation3] ss:$24 sps:$4 sm:$0xff]  }
 0x466   : > { %vm1414_vm12 = vcmp.ge.f32.partialorder %v1363_v11, 0.0  ;;  %v1365_v6 = vadd.f32 %v1364_v14, %v330_v32  ;;  %v1424_v18 = vsel %vm1416_vm13, %v339_v34, %v347_v13  ;;  %v1409_v23 = vpop.f32.mrf.mxu1 }
 0x467   : > { %v1422_v17 = vsel %vm1414_vm12, %v339_v34, %v347_v13  ;;  %v1366_v19 = vpop.f32.mrf.mxu0  ;;  %vm1417_vm15 = vcmp.ge.f32.partialorder %v1408_v8, 0.0  ;;  %v1432_v26 = vmul.f32 %v1424_v18, %v1406_v12  ;;  %v1410_v33 = vadd.f32 %v1409_v23, %v335_v0 }
 0x468   : > { %vm1415_vm14 = vcmp.ge.f32.partialorder %v1365_v6, 0.0  ;;  %v1430_v56 = vmul.f32 %v1422_v17, %v1363_v11  ;;  %v1425_v28 = vsel %vm1417_vm15, %v339_v34, %v347_v13  ;;  %v1367_v29 = vadd.f32 %v1366_v19, %v335_v0  ;;  %v1411_v36 = vpop.f32.mrf.mxu1 }
 0x469   : > { %v1423_v58 = vsel %vm1415_vm14, %v339_v34, %v347_v13  ;;  %v1368_v35 = vpop.f32.mrf.mxu0  ;;  %v1433_v38 = vmul.f32 %v1425_v28, %v1408_v8  ;;  %v1412_v41 = vadd.f32 %v1411_v36, %v335_v0  ;;  %vm1420_vm2 = vcmp.ge.f32.partialorder %v1410_v33, 0.0 }
 0x46a   : > { %v1431_v37 = vmul.f32 %v1423_v58, %v1365_v6  ;;  %v1369_v40 = vadd.f32 %v1368_v35, %v335_v0  ;;  %vm1418_vm0 = vcmp.ge.f32.partialorder %v1367_v29, 0.0  ;;  %v1438_v57 = vadd.f32 %v1430_v56, %v355_v27  ;;  %v1580_v6 = vpop.permute.xlu1 %1579 }
 0x46b   : > { %v1440_v51 = vadd.f32 %v1432_v26, %v355_v27  ;;  %v1426_v1 = vsel %vm1418_vm0, %v343_v50, %v351_v2  ;;  %v1428_v42 = vsel %vm1420_vm2, %v343_v50, %v351_v2  ;;  %vm1421_vm6 = vcmp.ge.f32.partialorder %v1412_v41, 0.0 }
 0x46c   : > { %vm1419_vm3 = vcmp.ge.f32.partialorder %v1369_v40, 0.0  ;;  %v1434_v45 = vmul.f32 %v1426_v1, %v1367_v29  ;;  %v1436_v47 = vmul.f32 %v1428_v42, %v1410_v33  ;;  %v1429_v53 = vsel %vm1421_vm6, %v343_v50, %v351_v2 }
 0x46d   : > { %v1427_v49 = vsel %vm1419_vm3, %v343_v50, %v351_v2  ;;  %v1437_v39 = vmul.f32 %v1429_v53, %v1412_v41  ;;  %v1439_v43 = vadd.f32 %v1431_v37, %v355_v27  ;;  %v1441_v52 = vadd.f32 %v1433_v38, %v355_v27 }
 0x46e   : > { %v1435_v48 = vmul.f32 %v1427_v49, %v1369_v40  ;;  %v1467_v54 = vmul.f32 %v1450_v7, %v1438_v57  ;;  %v1469_v55 = vmul.f32 %v1458_v5, %v1440_v51  ;;  %v1442_v46 = vadd.f32 %v1434_v45, %v359_v44  ;;  %v2024_v45 = vld [vmem:[%s2847_s5 + $0x20] sm:$0xff] }
 0x46f   : > { %v1444_v31 = vadd.f32 %v1436_v47, %v359_v44  ;;  %v1468_v59 = vmul.f32 %v1454_v24, %v1439_v43  ;;  %v1470_v60 = vmul.f32 %v1462_v25, %v1441_v52  ;;  %v1445_v62 = vadd.f32 %v1437_v39, %v359_v44  ;;  %v2025_v47 = vld [vmem:[%s2847_s5 + $0x28] sm:$0xff] }
 0x470   : > { %v1443_v61 = vadd.f32 %v1435_v48, %v359_v44  ;;  %v1471_v63 = vmul.f32 %v1450_v7, %v1442_v46 }
 0x471   : > { %v1473_v15 = vmul.f32 %v1458_v5, %v1444_v31  ;;  %v2101_v30 = vpack.c.bf16 %v1468_v59, %v1467_v54  ;;  %v2102_v32 = vpack.c.bf16 %v1470_v60, %v1469_v55  ;;  %v1474_v0 = vmul.f32 %v1462_v25, %v1445_v62  ;;  %v1594_v5 = vpop.permute.xlu0 %1593 }
 0x472   : > { %v1472_v34 = vmul.f32 %v1454_v24, %v1443_v61  ;;  %v2727_v4 = vpack.c.bf16 %v1471_v63, %v1467_v54 }
 0x473   : > { %1499 = vst [vmem:[#allocation3 + $0x4] sm:$0xff] %v2101_v30  ;;  %1500 = vst [vmem:[#allocation3 + $0xc] sm:$0xff] %v2102_v32  ;;  %v2104_v2 = vpack.c.bf16 %v1474_v0, %v1473_v15  ;;  %v2725_v3 = vpack.c.bf16 %v1473_v15, %v1469_v55  ;;  %v2739_v11 = vpack.c.bf16 %v1474_v0, %v1470_v60 }
 0x474   : > { %v2103_v50 = vpack.c.bf16 %v1472_v34, %v1471_v63  ;;  %1585 = vrot.lane.b32.xlu1 %v2727_v4, %s2225_s14  ;;  %v2733_v10 = vpack.c.bf16 %v1472_v34, %v1468_v59 }
 0x475   : > { %1502 = vst [vmem:[#allocation3 + $0x24] sm:$0xff] %v2104_v2  ;;  %1589 = vrot.lane.b32.xlu0 %v2725_v3, %s2225_s14 }
 0x476   : > { %1501 = vst [vmem:[#allocation3 + $0x1c] sm:$0xff] %v2103_v50 }
 0x478   : > { %1587 = vrot.lane.b32.xlu1 %v2733_v10, %s2225_s14 }
 0x479   : > { %1573 = vrot.lane.b32.xlu0 %v2733_v10, %s2219_s8 }
 0x47c   : > { %1591 = vrot.lane.b32.xlu1 %v2739_v11, %s2225_s14  ;;  %v2190_v13 = vld [vmem:[#allocation3 + $0xc] ss:$24 sps:$4 sm:$0xff]   ;;  %v2194_v7 = vld [vmem:[#allocation3 + $0x10] ss:$24 sps:$4 sm:$0xff]  }
 0x47d   : > { %1577 = vrot.lane.b32.xlu0 %v2739_v11, %s2219_s8  ;;  %v2188_v12 = vld [vmem:[#allocation3 + $0x4] ss:$24 sps:$4 sm:$0xff]   ;;  %v2192_v14 = vld [vmem:[#allocation3 + $0x8] ss:$24 sps:$4 sm:$0xff]  }
 0x480   : > { %1571 = vrot.lane.b32.xlu1 %v2727_v4, %s2219_s8 }
 0x481   : > { %1538 = vrot.lane.b32.xlu0 %v2188_v12, %s2223_s12 }
 0x484   : > { %1575 = vrot.lane.b32.xlu1 %v2725_v3, %s2219_s8 }
 0x485   : > { %1542 = vrot.lane.b32.xlu0 %v2190_v13, %s2223_s12 }
 0x488   : > { %1540 = vrot.lane.b32.xlu1 %v2192_v14, %s2223_s12 }
 0x489   : > { %1536 = vrot.lane.b32.xlu0 %v2193_v16, %s2223_s12 }
 0x48c   : > { %1544 = vrot.lane.b32.xlu1 %v2194_v7, %s2223_s12 }
 0x48d   : > { %1608 = vrot.lane.b32.xlu0 %v2188_v12, %s2226_s15 }
 0x490   : > { %1610 = vrot.lane.b32.xlu1 %v2192_v14, %s2226_s15 }
 0x4e6   : > { %v1586_v17 = vpop.permute.xlu1 %1585 }
 0x4e7   : > { %v1590_v8 = vpop.permute.xlu0 %1589  ;;  %1636 = vrot.lane.b32.xlu1 %v1586_v17, %s2226_s15 }
 0x4ea   : > { %v1588_v18 = vpop.permute.xlu1 %1587 }
 0x4eb   : > { %v1595_v19 = vsel %vm604_vm7, %v1586_v17, %v1588_v18  ;;  %v1574_v23 = vpop.permute.xlu0 %1573  ;;  %v1596_v38 = vsel %vm604_vm7, %v1588_v18, %v1590_v8 }
 0x4ec   : > { %1638 = vrot.lane.b32.xlu1 %v1595_v19, %s2226_s15 }
 0x4ee   : > { %v1592_v24 = vpop.permute.xlu1 %1591 }
 0x4ef   : > { %v1597_v25 = vsel %vm604_vm7, %v1590_v8, %v1592_v24  ;;  %v1578_v56 = vpop.permute.xlu0 %1577  ;;  %v1598_v57 = vsel %vm604_vm7, %v1592_v24, %v1594_v5 }
 0x4f0   : > { %1642 = vrot.lane.b32.xlu1 %v1597_v25, %s2226_s15  ;;  %v1584_v33 = vsel %vm574_vm1, %v1578_v56, %v1580_v6 }
 0x4f2   : > { %v1572_v26 = vpop.permute.xlu1 %1571 }
 0x4f3   : > { %1626 = vrot.lane.b32.xlu0 %v1572_v26, %s2226_s15  ;;  %v1539_v28 = vpop.permute.xlu0 %1538  ;;  %v1581_v1 = vsel %vm574_vm1, %v1572_v26, %v1574_v23 }
 0x4f6   : > { %v1576_v27 = vpop.permute.xlu1 %1575 }
 0x4f7   : > { %v1582_v58 = vsel %vm574_vm1, %v1574_v23, %v1576_v27  ;;  %v1543_v35 = vpop.permute.xlu0 %1542  ;;  %v1583_v42 = vsel %vm574_vm1, %v1576_v27, %v1578_v56  ;;  %v2195_v23 = vld [vmem:[%s2845_s3] sm:$0xff]   ;;  %vm1678_vm1 = vcmask 523264   ;;  %v2026_v56 = vld [vmem:[%s2847_s5 + $0x30] sm:$0xff] }
 0x4f8   : > { %1630 = vrot.lane.b32.xlu1 %v1582_v58, %s2226_s15 }
 0x4fa   : > { %v1541_v29 = vpop.permute.xlu1 %1540 }
 0x4fb   : > { %v1547_v37 = vsel %vm480_vm5, %v1539_v28, %v1541_v29  ;;  %v1537_v41 = vpop.permute.xlu0 %1536  ;;  %v1548_v44 = vsel %vm480_vm5, %v1541_v29, %v1543_v35 }
 0x4fc   : > { %1634 = vrot.lane.b32.xlu1 %v1584_v33, %s2226_s15  ;;  %v1546_v51 = vsel %vm480_vm5, %v1537_v41, %v1539_v28 }
 0x4fe   : > { %v1545_v36 = vpop.permute.xlu1 %1544 }
 0x4ff   : > { %1624 = vrot.lane.b32.xlu0 %v1545_v36, %s2226_s15  ;;  %v1549_v40 = vsel %vm480_vm5, %v1543_v35, %v1545_v36  ;;  %v1609_v43 = vpop.permute.xlu0 %1608 }
 0x500   : > { %1618 = vrot.lane.b32.xlu1 %v1547_v37, %s2226_s15 }
 0x502   : > { %v1611_v49 = vpop.permute.xlu1 %1610 }
 0x503   : > { %1640 = vrot.lane.b32.xlu0 %v1596_v38, %s2226_s15  ;;  %v1647_v6 = vsel %vm710_vm9, %v1609_v43, %v1611_v49 }
 0x504   : > { %1622 = vrot.lane.b32.xlu1 %v1549_v40, %s2226_s15 }
 0x507   : > { %1644 = vrot.lane.b32.xlu0 %v1598_v57, %s2226_s15 }
 0x508   : > { %1616 = vrot.lane.b32.xlu1 %v1546_v51, %s2226_s15 }
 0x50b   : > { %1628 = vrot.lane.b32.xlu0 %v1581_v1, %s2226_s15 }
 0x50c   : > { %1614 = vrot.lane.b32.xlu1 %v2194_v7, %s2226_s15 }
 0x50f   : > { %1632 = vrot.lane.b32.xlu0 %v1583_v42, %s2226_s15 }
 0x510   : > { %366 = vperm.xlu1 %2147, %v2024_v45  }
 0x513   : > { %1620 = vrot.lane.b32.xlu0 %v1548_v44, %s2226_s15 }
 0x514   : > { %2149 = vset.pattern.permute.xlu1 %v2228_v20 }
 0x515   : > { %375 = vperm.xlu1 %2149, %v2024_v45  }
 0x517   : > { %1612 = vrot.lane.b32.xlu0 %v2190_v13, %s2226_s15 }
 0x519   : > { %379 = vperm.xlu1 %2149, %v2025_v47  }
 0x51b   : > { %1606 = vrot.lane.b32.xlu0 %v2193_v16, %s2226_s15 }
 0x51d   : > { %2151 = vset.pattern.permute.xlu1 %v2229_v21 }
 0x51e   : > { %387 = vperm.xlu1 %2151, %v2025_v47  }
 0x51f   : > { %371 = vperm.xlu0 %2148, %v2025_v47  }
 0x522   : > { %2152 = vset.pattern.permute.xlu1 %v2230_v22 }
 0x523   : > { %2150 = vset.pattern.permute.xlu0 %v2229_v21  ;;  %391 = vperm.xlu1 %2152, %v2024_v45  }
 0x524   : > { %383 = vperm.xlu0 %2150, %v2024_v45  }
 0x527   : > { %2154 = vset.pattern.permute.xlu1 %v2227_v9 }
 0x528   : > { %2153 = vset.pattern.permute.xlu0 %v2230_v22  ;;  %402 = vperm.xlu1 %2154, %v2026_v56  }
 0x529   : > { %395 = vperm.xlu0 %2153, %v2025_v47  }
 0x52c   : > { %2155 = vset.pattern.permute.xlu1 %v2228_v20 }
 0x52d   : > { %2156 = vset.pattern.permute.xlu0 %v2229_v21  ;;  %406 = vperm.xlu1 %2155, %v2026_v56  }
 0x52e   : > { %410 = vperm.xlu0 %2156, %v2026_v56  }
 0x531   : > { %2157 = vset.pattern.permute.xlu1 %v2230_v22 }
 0x532   : > { %2158 = vset.pattern.permute.xlu0 %v2230_v22  ;;  %414 = vperm.xlu1 %2157, %v2026_v56  }
 0x559   : > { %v1637_v53 = vpop.permute.xlu1 %1636 }
 0x55e   : > { %v1639_v48 = vpop.permute.xlu1 %1638 }
 0x55f   : > { %v1658_v60 = vsel %vm710_vm9, %v1637_v53, %v1639_v48 }
 0x562   : > { %v1643_v39 = vpop.permute.xlu1 %1642 }
 0x565   : > { %v1627_v54 = vpop.permute.xlu0 %1626 }
 0x56a   : > { %v1631_v52 = vpop.permute.xlu1 %1630 }
 0x56e   : > { %v1635_v55 = vpop.permute.xlu1 %1634 }
 0x571   : > { %v1625_v46 = vpop.permute.xlu0 %1624 }
 0x572   : > { %v1619_v61 = vpop.permute.xlu1 %1618 }
 0x575   : > { %v1641_v31 = vpop.permute.xlu0 %1640 }
 0x576   : > { %v1659_v59 = vsel %vm710_vm9, %v1639_v48, %v1641_v31  ;;  %v1660_v63 = vsel %vm710_vm9, %v1641_v31, %v1643_v39  ;;  %v1623_v15 = vpop.permute.xlu1 %1622 }
 0x577   : > { %1690 = vmatprep.subr.bf16.mxu0 %v1659_v59  ;;  %v1653_v13 = vsel %vm710_vm9, %v1623_v15, %v1625_v46 }
 0x578   : > { %1691 = vmatpush1.bf16.msra.mxu0 %v1658_v60 }
 0x579   : > { %v1645_v62 = vpop.permute.xlu0 %1644 }
 0x57a   : > { %v1661_v21 = vsel %vm710_vm9, %v1643_v39, %v1645_v62  ;;  %v1617_v12 = vpop.permute.xlu1 %1616 }
 0x57b   : > { %1733 = vmatprep.subr.bf16.mxu1 %v1661_v21  ;;  %v1650_v5 = vsel %vm710_vm9, %v1617_v12, %v1619_v61 }
 0x57c   : > { %1734 = vmatpush1.bf16.msra.mxu1 %v1660_v63 }
 0x57d   : > { %v1629_v30 = vpop.permute.xlu0 %1628 }
 0x57e   : > { %v1654_v32 = vsel %vm710_vm9, %v1627_v54, %v1629_v30  ;;  %v1655_v34 = vsel %vm710_vm9, %v1629_v30, %v1631_v52  ;;  %v1615_v8 = vpop.permute.xlu1 %1614 }
 0x57f   : > { %1692 = vmatprep.subr.bf16.mxu0 %v1655_v34 }
 0x580   : > { %1693 = vmatpush1.bf16.msra.mxu0 %v1654_v32 }
 0x581   : > { %v1633_v0 = vpop.permute.xlu0 %1632 }
 0x582   : > { %v1656_v50 = vsel %vm710_vm9, %v1631_v52, %v1633_v0  ;;  %v1657_v2 = vsel %vm710_vm9, %v1633_v0, %v1635_v55 }
 0x583   : > { %1735 = vmatprep.subr.bf16.mxu1 %v1657_v2 }
 0x584   : > { %1736 = vmatpush1.bf16.msra.mxu1 %v1656_v50 }
 0x585   : > { %v1621_v14 = vpop.permute.xlu0 %1620  ;;  %1737 = vmatprep.subr.bf16.mxu1 %v1653_v13 }
 0x586   : > { %v1652_v16 = vsel %vm710_vm9, %v1621_v14, %v1623_v15  ;;  %v1651_v7 = vsel %vm710_vm9, %v1619_v61, %v1621_v14 }
 0x587   : > { %1694 = vmatprep.subr.bf16.mxu0 %v1651_v7 }
 0x588   : > { %1695 = vmatpush1.bf16.msra.mxu0 %v1650_v5  ;;  %1738 = vmatpush1.bf16.msra.mxu1 %v1652_v16 }
 0x589   : > { %v1613_v17 = vpop.permute.xlu0 %1612  ;;  %1696 = vmatprep.subr.bf16.mxu0 %v1647_v6 }
 0x58a   : > { %v1648_v18 = vsel %vm710_vm9, %v1611_v49, %v1613_v17  ;;  %v1649_v19 = vsel %vm710_vm9, %v1613_v17, %v1615_v8  ;;  %v2198_v8 = vld [vmem:[#allocation2 + $0x10] ss:$24 sps:$4 sm:$0xff]   ;;  %v2196_v17 = vld [vmem:[#allocation2 + $0xc] ss:$24 sps:$4 sm:$0xff]  }
 0x58b   : > { %1739 = vmatprep.subr.bf16.mxu1 %v1649_v19  ;;  %v367_v26 = vpop.permute.xlu1 %366  ;;  %v2199_v19 = vld [vmem:[#allocation2 + $0x4] ss:$24 sps:$4 sm:$0xff]  }
 0x58c   : > { %1740 = vmatpush1.bf16.msra.mxu1 %v1648_v18  ;;  %v2201_v18 = vld [vmem:[#allocation2 + $0x8] ss:$24 sps:$4 sm:$0xff]  }
 0x58d   : > { %v1607_v24 = vpop.permute.xlu0 %1606 }
 0x58e   : > { %v1646_v25 = vsel %vm710_vm9, %v1607_v24, %v1609_v43 }
 0x58f   : > { %1697 = vmatpush1.bf16.msra.mxu0 %v1646_v25  ;;  %2083 = vmatmul.mubr.msk.bf16.vlgmr.msra.gmra.mxu1 %vm1678_vm1, %v2195_v23 }
 0x590   : > { %1930 = vmatprep.mubr.bf16.mxu1 %v2227_v9  ;;  %v376_v27 = vpop.permute.xlu1 %375 }
 0x592   : > { %2082 = vmatmul.mubr.msk.bf16.vlgmr.msra.gmra.mxu0 %vm1678_vm1, %v2195_v23 }
 0x593   : > { %1889 = vmatprep.mubr.bf16.mxu0 %v2227_v9 }
 0x594   : > { %v380_v28 = vpop.permute.xlu1 %379 }
 0x599   : > { %v388_v20 = vpop.permute.xlu1 %387 }
 0x59a   : > { %v372_v58 = vpop.permute.xlu0 %371 }
 0x59e   : > { %v392_v59 = vpop.permute.xlu1 %391 }
 0x59f   : > { %v384_v37 = vpop.permute.xlu0 %383 }
 0x5a4   : > { %v396_v39 = vpop.permute.xlu0 %395 }
 0x5a9   : > { %v411_v25 = vpop.permute.xlu0 %410 }
 0x64f   : > { %v1759_v29 = vpop.f32.mrf.mxu1 }
 0x650   : > { %v1760_v9 = vadd.f32 %v1759_v29, %v367_v26 }
 0x651   : > { %v1761_v33 = vpop.f32.mrf.mxu1 }
 0x652   : > { %v1762_v35 = vadd.f32 %v1761_v33, %v367_v26  ;;  %v1716_v36 = vpop.f32.mrf.mxu0  ;;  %vm1770_vm5 = vcmp.ge.f32.partialorder %v1760_v9, 0.0 }
 0x653   : > { %v1717_v38 = vadd.f32 %v1716_v36, %v367_v26  ;;  %v1763_v40 = vpop.f32.mrf.mxu1  ;;  %v1778_v42 = vsel %vm1770_vm5, %v376_v27, %v384_v37 }
 0x654   : > { %vm1771_vm7 = vcmp.ge.f32.partialorder %v1762_v35, 0.0  ;;  %v1764_v41 = vadd.f32 %v1763_v40, %v372_v58  ;;  %v1718_v57 = vpop.f32.mrf.mxu0  ;;  %v1786_v43 = vmul.f32 %v1778_v42, %v1760_v9 }
 0x655   : > { %v1779_v51 = vsel %vm1771_vm7, %v376_v27, %v384_v37  ;;  %v1719_v22 = vadd.f32 %v1718_v57, %v367_v26  ;;  %v1765_v1 = vpop.f32.mrf.mxu1  ;;  %vm1768_vm10 = vcmp.ge.f32.partialorder %v1717_v38, 0.0 }
 0x656   : > { %vm1774_vm9 = vcmp.ge.f32.partialorder %v1764_v41, 0.0  ;;  %v1766_v44 = vadd.f32 %v1765_v1, %v372_v58  ;;  %v1720_v45 = vpop.f32.mrf.mxu0  ;;  %v1787_v47 = vmul.f32 %v1779_v51, %v1762_v35  ;;  %v1776_v46 = vsel %vm1768_vm10, %v376_v27, %v384_v37 }
 0x657   : > { %v1782_v49 = vsel %vm1774_vm9, %v380_v28, %v388_v20  ;;  %vm1769_vm11 = vcmp.ge.f32.partialorder %v1719_v22, 0.0  ;;  %v1721_v55 = vadd.f32 %v1720_v45, %v372_v58  ;;  %v1784_v30 = vmul.f32 %v1776_v46, %v1717_v38 }
 0x658   : > { %v1790_v53 = vmul.f32 %v1782_v49, %v1764_v41  ;;  %vm1775_vm8 = vcmp.ge.f32.partialorder %v1766_v44, 0.0  ;;  %v1722_v48 = vpop.f32.mrf.mxu0  ;;  %v1777_v52 = vsel %vm1769_vm11, %v376_v27, %v384_v37  ;;  %v1795_v61 = vadd.f32 %v1787_v47, %v392_v59 }
 0x659   : > { %v1783_v54 = vsel %vm1775_vm8, %v380_v28, %v388_v20  ;;  %v1723_v60 = vadd.f32 %v1722_v48, %v372_v58  ;;  %vm1772_vm12 = vcmp.ge.f32.partialorder %v1721_v55, 0.0  ;;  %v1785_v21 = vmul.f32 %v1777_v52, %v1719_v22 }
 0x65a   : > { %v1791_v31 = vmul.f32 %v1783_v54, %v1766_v44  ;;  %v1798_v62 = vadd.f32 %v1790_v53, %v396_v39  ;;  %v1780_v63 = vsel %vm1772_vm12, %v380_v28, %v388_v20  ;;  %v1794_v32 = vadd.f32 %v1786_v43, %v392_v59 }
 0x65b   : > { %vm1773_vm13 = vcmp.ge.f32.partialorder %v1723_v60, 0.0  ;;  %v1788_v34 = vmul.f32 %v1780_v63, %v1721_v55  ;;  %v1793_v14 = vadd.f32 %v1785_v21, %v392_v59  ;;  %v1792_v7 = vadd.f32 %v1784_v30, %v392_v59 }
 0x65c   : > { %v1799_v15 = vadd.f32 %v1791_v31, %v396_v39  ;;  %v1781_v0 = vsel %vm1773_vm13, %v380_v28, %v388_v20  ;;  %v1810_v13 = vpack.c.bf16 %v1798_v62, %v1794_v32 }
 0x65d   : > { %v1789_v50 = vmul.f32 %v1781_v0, %v1723_v60  ;;  %v1796_v12 = vadd.f32 %v1788_v34, %v396_v39 }
 0x65e   : > { %v1811_v2 = vpack.c.bf16 %v1799_v15, %v1795_v61 }
 0x65f   : > { %v1797_v16 = vadd.f32 %v1789_v50, %v396_v39  ;;  %v1808_v6 = vpack.c.bf16 %v1796_v12, %v1792_v7 }
 0x660   : > { %1908 = vmatprep.subr.bf16.mxu1 %v1811_v2 }
 0x661   : > { %1909 = vmatpush1.bf16.msra.mxu1 %v1810_v13  ;;  %v1809_v5 = vpack.c.bf16 %v1797_v16, %v1793_v14 }
 0x662   : > { %1910 = vmatprep.subr.bf16.mxu1 %v2739_v11  ;;  %v1852_v11 = vld [vmem:[%s2846_s4] sm:$0xf] }
 0x663   : > { %1867 = vmatprep.subr.bf16.mxu0 %v1809_v5 }
 0x664   : > { %1868 = vmatpush1.bf16.msra.mxu0 %v1808_v6 }
 0x665   : > { %1911 = vmatpush1.bf16.msra.mxu1 %v2725_v3  ;;  %1869 = vmatprep.subr.bf16.mxu0 %v2733_v10  ;;  %v403_v3 = vpop.permute.xlu1 %402 }
 0x666   : > { %1912 = vmatprep.subr.bf16.mxu1 %v2198_v8 }
 0x668   : > { %1870 = vmatpush1.bf16.msra.mxu0 %v2727_v4 }
 0x669   : > { %1913 = vmatpush1.bf16.msra.mxu1 %v2196_v17  ;;  %1871 = vmatprep.subr.bf16.mxu0 %v2201_v18  ;;  %v407_v10 = vpop.permute.xlu1 %406 }
 0x66c   : > { %2093 = vmatmul.mubr.msk.bf16.vlgmr.msra.gmra.mxu1 %vm1116_vm4, %v1852_v11  ;;  %1872 = vmatpush1.bf16.msra.mxu0 %v2199_v19 }
 0x66d   : > { %v415_v26 = vpop.permute.xlu1 %414 }
 0x66f   : > { %2092 = vmatmul.mubr.msk.bf16.vlgmr.msra.gmra.mxu0 %vm1116_vm4, %v1852_v11 }
 0x72c   : > { %v1932_v23 = vpop.f32.mrf.mxu1 }
 0x72d   : > { %v1933_v24 = vadd.f32 %v1932_v23, %v403_v3 }
 0x72e   : > { %v1934_v56 = vpop.f32.mrf.mxu1 }
 0x72f   : > { %vm1941_vm14 = vcmp.ge.f32.partialorder %v1933_v24, 0.0  ;;  %v1935_v4 = vadd.f32 %v1934_v56, %v403_v3  ;;  %v1891_v58 = vpop.f32.mrf.mxu0 }
 0x730   : > { %v1945_v27 = vsel %vm1941_vm14, %v407_v10, %v411_v25  ;;  %v1936_v28 = vpop.f32.mrf.mxu1  ;;  %v1892_v9 = vadd.f32 %v1891_v58, %v403_v3 }
 0x731   : > { %vm1942_vm15 = vcmp.ge.f32.partialorder %v1935_v4, 0.0  ;;  %v1949_v29 = vmul.f32 %v1945_v27, %v1933_v24  ;;  %v1893_v35 = vpop.f32.mrf.mxu0 }
 0x732   : > { %v1946_v33 = vsel %vm1942_vm15, %v407_v10, %v411_v25  ;;  %v1937_v36 = vpop.f32.mrf.mxu1  ;;  %vm1939_vm4 = vcmp.ge.f32.partialorder %v1892_v9, 0.0  ;;  %v1894_v38 = vadd.f32 %v1893_v35, %v403_v3 }
 0x733   : > { %v1950_v37 = vmul.f32 %v1946_v33, %v1935_v4  ;;  %v1953_v40 = vadd.f32 %v1949_v29, %v415_v26  ;;  %v1943_v20 = vsel %vm1939_vm4, %v407_v10, %v411_v25  ;;  %v1895_v41 = vpop.f32.mrf.mxu0 }
 0x734   : > { %v1947_v57 = vmul.f32 %v1943_v20, %v1892_v9  ;;  %vm1940_vm0 = vcmp.ge.f32.partialorder %v1894_v38, 0.0 }
 0x735   : > { %v1954_v51 = vadd.f32 %v1950_v37, %v415_v26  ;;  %1957 = vst [vmem:[%s278_s17 + $0x10] sm:$0xff] %v1953_v40  ;;  %v1944_v22 = vsel %vm1940_vm0, %v407_v10, %v411_v25  ;;  %v1896_v1 = vpop.f32.mrf.mxu0 }
 0x736   : > { %v1948_v42 = vmul.f32 %v1944_v22, %v1894_v38  ;;  %v1951_v44 = vadd.f32 %v1947_v57, %v415_v26 }
 0x737   : > { %1958 = vst [vmem:[%s278_s17 + $0x18] sm:$0xff] %v1954_v51 }
 0x738   : > { %v1952_v45 = vadd.f32 %v1948_v42, %v415_v26  ;;  %1955 = vst [vmem:[%s278_s17] sm:$0xff] %v1951_v44 }
 0x73a   : > { %1956 = vst [vmem:[%s278_s17 + $0x8] sm:$0xff] %v1952_v45 }
 0x73b PF: > { %s17_s24 = sadd.s32 1, %s2216_s24  }
 0x73c   : > { %p14_p4 = scmp.ge.s32.totalorder %s17_s24, 4  }
 0x73e   :  { %16 = sbr.rel (!%p14_p4) target bundleno = 1 (0x1), region = 81 }

</bundles_post_ra>
